<compile_context>
chip_gen: v6e
topology: v6e:2x2x1
jax: 0.10.0
libtpu: 0.0.40
codegen_flags: <defaults>
</compile_context>

<pallas_src>
import jax
import jax.numpy as jnp
from jax import lax
from jax.experimental import pallas as pl
from jax.experimental.pallas import tpu as pltpu

NEG_SLOPE = 0.001  # LeakyReLU(0.001)


def _round_up(x, m):
    return ((x + m - 1) // m) * m


def _padded_block_bytes(shape, dtype):
    """Rough VMEM bytes of one buffer after Mosaic (sublane, lane) padding."""
    itemsize = jnp.dtype(dtype).itemsize
    if len(shape) < 2:
        n = 1
        for s in shape:
            n *= int(s)
        return _round_up(max(n, 1) * itemsize, 4096)
    lane = _round_up(int(shape[-1]), 128)
    sublane_mult = 8 * max(1, 4 // itemsize)          # f32 -> 8, bf16 -> 16
    sub = _round_up(int(shape[-2]), sublane_mult)
    lead = 1
    for s in shape[:-2]:
        lead *= int(s)
    return lead * sub * lane * itemsize


def _node_upsampling_kernel(xf_ref, x_ref, w_ref, b_ref, o_ref, z3_ref):
    # xf : (TB, K)            bf16  flattened input (K = D * N_in), lane-dense
    # x  : (TB, D, N_in)      bf16  input, original layout
    # w  : (M, K)             bf16  Linear weight (M = D * N_out), resident
    # b  : (1, M)             f32   Linear bias
    # o  : (TB, N_out * N_in) f32   lane-dense output slab
    # z3 : (TB, D, N_out)     f32   VMEM scratch for the relayouted Z
    _, D, N_in = x_ref.shape
    N_out = z3_ref.shape[2]

    # ---- stage 1: Z = x_flat @ W^T + b (MXU, bf16 operands, f32 accum) -----
    # The weight transpose is folded into dimension_numbers (contract K,
    # which is dim 1 of both operands) — no transposed copy of W anywhere.
    z = lax.dot_general(xf_ref[...], w_ref[...], (((1,), (1,)), ((), ())),
                        preferred_element_type=jnp.float32)
    z = z + b_ref[...]                                       # (TB, M) f32

    # ---- relayout Z: (TB, D*N_out) -> (TB, D, N_out) via VMEM scratch ------
    # D static lane-slice stores (known-good Mosaic lowering).
    # TODO(synk): if a bundle dump shows this relayout rivalling stage 2,
    # switch to a value-level z.reshape(TB, D, N_out) (minor-dim split) and
    # drop the scratch round-trip entirely.
    for d in range(D):
        z3_ref[:, d, :] = z[:, d * N_out:(d + 1) * N_out]

    # ---- stage 2: out[b] = Z3[b]^T_(D) @ x[b] (bf16 operands, f32 accum) ---
    # TODO(synk): this lowers to TB tiny (N_out x D)@(D x N_in) MXU matmuls;
    # if their push/pop latency dominates the bundle dump, reformulate as a
    # VPU multiply-accumulate loop over D instead.
    acc = lax.dot_general(z3_ref[...].astype(jnp.bfloat16), x_ref[...],
                          (((1,), (1,)), ((0,), (0,))),
                          preferred_element_type=jnp.float32)  # (TB, N_out, N_in)
    act = jnp.where(acc >= 0, acc, NEG_SLOPE * acc)

    # ---- lane-dense store: (TB, N_out, N_in) -> (TB, N_out*N_in) -----------
    # Keeps both the VMEM out buffer and the HBM write stream dense (N_in=8
    # would otherwise be 8/128-lane masked stores into a 16x-padded block).
    for n in range(N_out):
        o_ref[:, n * N_in:(n + 1) * N_in] = act[:, n, :]


def node_upsampling_forward(x, weight, bias, out_node_num):
    """Fused NodeUpsampling forward.

    x:      (B, D, N_in) float
    weight: (D*N_out, D*N_in) — pass bf16 (cast once at parameter-init time)
    bias:   (D*N_out,) float
    returns (B, N_out, N_in) float32
    """
    B, D, N_in = x.shape
    M, K = weight.shape
    N_out = out_node_num
    assert K == D * N_in and M == D * N_out

    # ---- batch tiling -------------------------------------------------------
    if B <= 8:
        TB = B                      # full-dim block is always legal
        B_pad = B
    else:
        # Cap the tile at 128 (fills the v5e MXU M dimension, modest VMEM) and
        # guarantee >= 2 "parallel" tiles so both v7x TensorCores get work.
        TB = min(128, _round_up(pl.cdiv(B, 2), 8))
        B_pad = _round_up(B, TB)
    num_tiles = B_pad // TB

    # ---- input prep (single bf16 cast; padded rows are dropped at the end) --
    x_bf = x.astype(jnp.bfloat16)
    w_bf = weight.astype(jnp.bfloat16)          # no-op if already bf16
    if B_pad != B:
        x_bf = jnp.pad(x_bf, ((0, B_pad - B), (0, 0), (0, 0)))
    # TODO(synk): x is streamed twice (flat + 3-D view); dedup if HBM-bound.
    x_flat = x_bf.reshape(B_pad, K)             # contiguous -> free reshape
    b2 = bias.reshape(1, M).astype(jnp.float32)

    # ---- generation-aware VMEM limit, sized from the padded block bytes -----
    needed = (
        2 * (_padded_block_bytes((TB, K), jnp.bfloat16)
             + _padded_block_bytes((TB, D, N_in), jnp.bfloat16)
             + _padded_block_bytes((TB, N_out * N_in), jnp.float32))  # streamed, 2-buffered
        + 2 * (_padded_block_bytes((M, K), jnp.bfloat16)
               + _padded_block_bytes((1, M), jnp.float32))            # resident (still 2-buffered)
        + _padded_block_bytes((TB, D, N_out), jnp.float32)            # scratch
    )
    try:
        cap = int(pltpu.get_tpu_info().vmem_capacity_bytes) - (8 << 20)
    except Exception:
        cap = 56 << 20              # stay safely under v7x's 64 MiB/TC physical VMEM
    vmem_limit_bytes = int(min(max(needed + (8 << 20), 32 << 20), max(cap, 32 << 20)))

    flops = 2 * B_pad * K * M + 2 * B_pad * N_out * D * N_in
    bytes_accessed = (2 * x_flat.size * 2          # x streamed twice, bf16
                      + w_bf.size * 2 + b2.size * 4
                      + B_pad * N_out * N_in * 4)

    out2d = pl.pallas_call(
        _node_upsampling_kernel,
        out_shape=jax.ShapeDtypeStruct((B_pad, N_out * N_in), jnp.float32),
        grid=(num_tiles,),
        in_specs=[
            pl.BlockSpec((TB, K), lambda i: (i, 0)),
            pl.BlockSpec((TB, D, N_in), lambda i: (i, 0, 0)),
            # Whole weight + bias resident in VMEM (constant index_map; tiny here).
            # TODO(synk): for multi-MiB weights, single-buffer them
            # (pipeline_mode=pl.Buffered(1) or a one-shot manual DMA) and/or add
            # a K-reduction grid axis ("arbitrary", last) with an f32 Z
            # accumulator so only a weight slice is resident.
            pl.BlockSpec((M, K), lambda i: (0, 0)),
            pl.BlockSpec((1, M), lambda i: (0, 0)),
        ],
        out_specs=pl.BlockSpec((TB, N_out * N_in), lambda i: (i, 0)),
        scratch_shapes=[pltpu.VMEM((TB, D, N_out), jnp.float32)],
        compiler_params=pltpu.CompilerParams(
            dimension_semantics=("parallel",),
            vmem_limit_bytes=vmem_limit_bytes,
        ),
        # TODO(synk): once stage 2 shrinks, consider pl.Buffered(3) on the
        # x/x_flat specs to keep the DMA engine ahead of the MXU.
        cost_estimate=pl.CostEstimate(flops=flops, transcendentals=0,
                                      bytes_accessed=bytes_accessed),
    )(x_flat, x_bf, w_bf, b2)

    return out2d[:B].reshape(B, N_out, N_in)


def _reference(x, weight, bias, out_node_num, *,
               stage1_dtype=jnp.float32, stage2_dtype=jnp.float32):
    """Pure-JAX reference of the (repaired) PyTorch forward."""
    B, D, N_in = x.shape
    N_out = out_node_num
    xf = x.reshape(B, -1).astype(stage1_dtype)
    w = weight.astype(stage1_dtype)
    z = jnp.dot(xf, w.T, preferred_element_type=jnp.float32) + bias
    z3 = z.reshape(B, D, N_out)
    out = jnp.einsum("bdn,bdm->bnm",
                     z3.astype(stage2_dtype), x.astype(stage2_dtype),
                     preferred_element_type=jnp.float32)
    return jnp.where(out >= 0, out, NEG_SLOPE * out)


if __name__ == "__main__":
    B = 2
    in_node_num = 8      # InNode_num   (N_in)
    out_node_num = 16    # outNode_num  (N_out)
    latent_dim = 32      # InLatent_dim (D)

    key = jax.random.PRNGKey(0)
    kx, kw, kb = jax.random.split(key, 3)

    in_features = in_node_num * latent_dim        # 256
    out_features = latent_dim * out_node_num      # 512
    bound = 1.0 / float(in_features) ** 0.5

    # Deterministic synthetic parameters (PyTorch-Linear-style uniform init).
    x = jax.random.normal(kx, (B, latent_dim, in_node_num), dtype=jnp.float32)
    weight = jax.random.uniform(kw, (out_features, in_features),
                                minval=-bound, maxval=bound, dtype=jnp.float32)
    bias = jax.random.uniform(kb, (out_features,),
                              minval=-bound, maxval=bound, dtype=jnp.float32)

    # Parameter-init-time cast: store the matmul weight in bf16 once so every
    # forward call streams half the weight bytes and feeds the MXU bf16.
    weight_bf16 = weight.astype(jnp.bfloat16)

    out = node_upsampling_forward(x, weight_bf16, bias, out_node_num)
    out = jax.block_until_ready(out)
    assert out.shape == (B, out_node_num, in_node_num)

    # Structural check: a reference with the SAME bf16 operand-rounding policy
    # (bf16 stage-1 and stage-2 operands, f32 accumulation) must match tightly.
    ref_policy = _reference(x, weight, bias, out_node_num,
                            stage1_dtype=jnp.bfloat16, stage2_dtype=jnp.bfloat16)
    assert jnp.allclose(out, ref_policy, atol=2e-3, rtol=2e-3), "Pallas output mismatch"

    # Precision check against exact f32 module math: only bf16 rounding of the
    # matmul operands separates the two, so the drift stays small.
    ref_f32 = _reference(x, weight, bias, out_node_num)
    assert jnp.allclose(out, ref_f32, atol=1e-1, rtol=5e-2), "bf16 drift too large"

    print("KERNEL_OK")
</pallas_src>

<mosaic_0001>
module attributes {stable_mosaic.version = 11 : i64} {
  func.func @_node_upsampling_kernel(%arg0: i32, %arg1: memref<2x256xbf16, #tpu.memory_space<vmem>>, %arg2: memref<2x32x8xbf16, #tpu.memory_space<vmem>>, %arg3: memref<512x256xbf16, #tpu.memory_space<vmem>>, %arg4: memref<1x512xf32, #tpu.memory_space<vmem>>, %arg5: memref<2x128xf32, #tpu.memory_space<vmem>>, %arg6: memref<2x32x16xf32, #tpu.memory_space<vmem>>) attributes {dimension_semantics = [#tpu.dimension_semantics<parallel>], iteration_bounds = array<i64: 1>, scalar_prefetch = 0 : i64, scratch_operands = 1 : i64, tpu.core_type = #tpu.core_type<tc>, window_params = [{transform_indices = @transform_0, window_bounds = array<i64: 2, 256>}, {transform_indices = @transform_1, window_bounds = array<i64: 2, 32, 8>}, {pipeline_mode = #tpu.pipeline_mode<synchronous>, transform_indices = @transform_2, window_bounds = array<i64: 512, 256>}, {pipeline_mode = #tpu.pipeline_mode<synchronous>, transform_indices = @transform_3, window_bounds = array<i64: 1, 512>}, {transform_indices = @transform_4, window_bounds = array<i64: 2, 128>}]} {
    %c0 = arith.constant 0 : index
    %c0_0 = arith.constant 0 : index
    %0 = vector.load %arg1[%c0, %c0_0] : memref<2x256xbf16, #tpu.memory_space<vmem>>, vector<2x256xbf16>
    %c0_1 = arith.constant 0 : index
    %c0_2 = arith.constant 0 : index
    %1 = vector.load %arg3[%c0_1, %c0_2] : memref<512x256xbf16, #tpu.memory_space<vmem>>, vector<512x256xbf16>
    %cst = arith.constant dense<0.000000e+00> : vector<2x512xf32>
    %2 = tpu.matmul %0, %1, %cst {dimension_numbers = #tpu.dot_dimension_numbers<[1], [1], [0], [0], [0, 0, 1, 0], [], []>} : vector<2x256xbf16>, vector<512x256xbf16>, vector<2x512xf32> -> vector<2x512xf32>
    %c0_3 = arith.constant 0 : index
    %c0_4 = arith.constant 0 : index
    %3 = vector.load %arg4[%c0_3, %c0_4] : memref<1x512xf32, #tpu.memory_space<vmem>>, vector<1x512xf32>
    %4 = vector.broadcast %3 : vector<1x512xf32> to vector<2x512xf32>
    %5 = arith.addf %2, %4 : vector<2x512xf32>
    %6 = vector.extract_strided_slice %5 {offsets = [0, 0], sizes = [2, 16], strides = [1, 1]} : vector<2x512xf32> to vector<2x16xf32>
    %c0_5 = arith.constant 0 : index
    %c0_6 = arith.constant 0 : index
    %c0_7 = arith.constant 0 : index
    %7 = vector.load %arg6[%c0_5, %c0_6, %c0_7] : memref<2x32x16xf32, #tpu.memory_space<vmem>>, vector<2x1x16xf32>
    %8 = vector.shape_cast %7 : vector<2x1x16xf32> to vector<2x16xf32>
    %9 = vector.shape_cast %6 : vector<2x16xf32> to vector<2x1x16xf32>
    tpu.vector_store %arg6[%c0_5, %c0_6, %c0_7], %9 {strides = array<i32>} : memref<2x32x16xf32, #tpu.memory_space<vmem>>, vector<2x1x16xf32>,
    %10 = vector.extract_strided_slice %5 {offsets = [0, 16], sizes = [2, 16], strides = [1, 1]} : vector<2x512xf32> to vector<2x16xf32>
    %c0_8 = arith.constant 0 : index
    %c1 = arith.constant 1 : index
    %c0_9 = arith.constant 0 : index
    %11 = vector.load %arg6[%c0_8, %c1, %c0_9] : memref<2x32x16xf32, #tpu.memory_space<vmem>>, vector<2x1x16xf32>
    %12 = vector.shape_cast %11 : vector<2x1x16xf32> to vector<2x16xf32>
    %13 = vector.shape_cast %10 : vector<2x16xf32> to vector<2x1x16xf32>
    tpu.vector_store %arg6[%c0_8, %c1, %c0_9], %13 {strides = array<i32>} : memref<2x32x16xf32, #tpu.memory_space<vmem>>, vector<2x1x16xf32>,
    %14 = vector.extract_strided_slice %5 {offsets = [0, 32], sizes = [2, 16], strides = [1, 1]} : vector<2x512xf32> to vector<2x16xf32>
    %c0_10 = arith.constant 0 : index
    %c2 = arith.constant 2 : index
    %c0_11 = arith.constant 0 : index
    %15 = vector.load %arg6[%c0_10, %c2, %c0_11] : memref<2x32x16xf32, #tpu.memory_space<vmem>>, vector<2x1x16xf32>
    %16 = vector.shape_cast %15 : vector<2x1x16xf32> to vector<2x16xf32>
    %17 = vector.shape_cast %14 : vector<2x16xf32> to vector<2x1x16xf32>
    tpu.vector_store %arg6[%c0_10, %c2, %c0_11], %17 {strides = array<i32>} : memref<2x32x16xf32, #tpu.memory_space<vmem>>, vector<2x1x16xf32>,
    %18 = vector.extract_strided_slice %5 {offsets = [0, 48], sizes = [2, 16], strides = [1, 1]} : vector<2x512xf32> to vector<2x16xf32>
    %c0_12 = arith.constant 0 : index
    %c3 = arith.constant 3 : index
    %c0_13 = arith.constant 0 : index
    %19 = vector.load %arg6[%c0_12, %c3, %c0_13] : memref<2x32x16xf32, #tpu.memory_space<vmem>>, vector<2x1x16xf32>
    %20 = vector.shape_cast %19 : vector<2x1x16xf32> to vector<2x16xf32>
    %21 = vector.shape_cast %18 : vector<2x16xf32> to vector<2x1x16xf32>
    tpu.vector_store %arg6[%c0_12, %c3, %c0_13], %21 {strides = array<i32>} : memref<2x32x16xf32, #tpu.memory_space<vmem>>, vector<2x1x16xf32>,
    %22 = vector.extract_strided_slice %5 {offsets = [0, 64], sizes = [2, 16], strides = [1, 1]} : vector<2x512xf32> to vector<2x16xf32>
    %c0_14 = arith.constant 0 : index
    %c4 = arith.constant 4 : index
    %c0_15 = arith.constant 0 : index
    %23 = vector.load %arg6[%c0_14, %c4, %c0_15] : memref<2x32x16xf32, #tpu.memory_space<vmem>>, vector<2x1x16xf32>
    %24 = vector.shape_cast %23 : vector<2x1x16xf32> to vector<2x16xf32>
    %25 = vector.shape_cast %22 : vector<2x16xf32> to vector<2x1x16xf32>
    tpu.vector_store %arg6[%c0_14, %c4, %c0_15], %25 {strides = array<i32>} : memref<2x32x16xf32, #tpu.memory_space<vmem>>, vector<2x1x16xf32>,
    %26 = vector.extract_strided_slice %5 {offsets = [0, 80], sizes = [2, 16], strides = [1, 1]} : vector<2x512xf32> to vector<2x16xf32>
    %c0_16 = arith.constant 0 : index
    %c5 = arith.constant 5 : index
    %c0_17 = arith.constant 0 : index
    %27 = vector.load %arg6[%c0_16, %c5, %c0_17] : memref<2x32x16xf32, #tpu.memory_space<vmem>>, vector<2x1x16xf32>
    %28 = vector.shape_cast %27 : vector<2x1x16xf32> to vector<2x16xf32>
    %29 = vector.shape_cast %26 : vector<2x16xf32> to vector<2x1x16xf32>
    tpu.vector_store %arg6[%c0_16, %c5, %c0_17], %29 {strides = array<i32>} : memref<2x32x16xf32, #tpu.memory_space<vmem>>, vector<2x1x16xf32>,
    %30 = vector.extract_strided_slice %5 {offsets = [0, 96], sizes = [2, 16], strides = [1, 1]} : vector<2x512xf32> to vector<2x16xf32>
    %c0_18 = arith.constant 0 : index
    %c6 = arith.constant 6 : index
    %c0_19 = arith.constant 0 : index
    %31 = vector.load %arg6[%c0_18, %c6, %c0_19] : memref<2x32x16xf32, #tpu.memory_space<vmem>>, vector<2x1x16xf32>
    %32 = vector.shape_cast %31 : vector<2x1x16xf32> to vector<2x16xf32>
    %33 = vector.shape_cast %30 : vector<2x16xf32> to vector<2x1x16xf32>
    tpu.vector_store %arg6[%c0_18, %c6, %c0_19], %33 {strides = array<i32>} : memref<2x32x16xf32, #tpu.memory_space<vmem>>, vector<2x1x16xf32>,
    %34 = vector.extract_strided_slice %5 {offsets = [0, 112], sizes = [2, 16], strides = [1, 1]} : vector<2x512xf32> to vector<2x16xf32>
    %c0_20 = arith.constant 0 : index
    %c7 = arith.constant 7 : index
    %c0_21 = arith.constant 0 : index
    %35 = vector.load %arg6[%c0_20, %c7, %c0_21] : memref<2x32x16xf32, #tpu.memory_space<vmem>>, vector<2x1x16xf32>
    %36 = vector.shape_cast %35 : vector<2x1x16xf32> to vector<2x16xf32>
    %37 = vector.shape_cast %34 : vector<2x16xf32> to vector<2x1x16xf32>
    tpu.vector_store %arg6[%c0_20, %c7, %c0_21], %37 {strides = array<i32>} : memref<2x32x16xf32, #tpu.memory_space<vmem>>, vector<2x1x16xf32>,
    %38 = vector.extract_strided_slice %5 {offsets = [0, 128], sizes = [2, 16], strides = [1, 1]} : vector<2x512xf32> to vector<2x16xf32>
    %c0_22 = arith.constant 0 : index
    %c8 = arith.constant 8 : index
    %c0_23 = arith.constant 0 : index
    %39 = vector.load %arg6[%c0_22, %c8, %c0_23] : memref<2x32x16xf32, #tpu.memory_space<vmem>>, vector<2x1x16xf32>
    %40 = vector.shape_cast %39 : vector<2x1x16xf32> to vector<2x16xf32>
    %41 = vector.shape_cast %38 : vector<2x16xf32> to vector<2x1x16xf32>
    tpu.vector_store %arg6[%c0_22, %c8, %c0_23], %41 {strides = array<i32>} : memref<2x32x16xf32, #tpu.memory_space<vmem>>, vector<2x1x16xf32>,
    %42 = vector.extract_strided_slice %5 {offsets = [0, 144], sizes = [2, 16], strides = [1, 1]} : vector<2x512xf32> to vector<2x16xf32>
    %c0_24 = arith.constant 0 : index
    %c9 = arith.constant 9 : index
    %c0_25 = arith.constant 0 : index
    %43 = vector.load %arg6[%c0_24, %c9, %c0_25] : memref<2x32x16xf32, #tpu.memory_space<vmem>>, vector<2x1x16xf32>
    %44 = vector.shape_cast %43 : vector<2x1x16xf32> to vector<2x16xf32>
    %45 = vector.shape_cast %42 : vector<2x16xf32> to vector<2x1x16xf32>
    tpu.vector_store %arg6[%c0_24, %c9, %c0_25], %45 {strides = array<i32>} : memref<2x32x16xf32, #tpu.memory_space<vmem>>, vector<2x1x16xf32>,
    %46 = vector.extract_strided_slice %5 {offsets = [0, 160], sizes = [2, 16], strides = [1, 1]} : vector<2x512xf32> to vector<2x16xf32>
    %c0_26 = arith.constant 0 : index
    %c10 = arith.constant 10 : index
    %c0_27 = arith.constant 0 : index
    %47 = vector.load %arg6[%c0_26, %c10, %c0_27] : memref<2x32x16xf32, #tpu.memory_space<vmem>>, vector<2x1x16xf32>
    %48 = vector.shape_cast %47 : vector<2x1x16xf32> to vector<2x16xf32>
    %49 = vector.shape_cast %46 : vector<2x16xf32> to vector<2x1x16xf32>
    tpu.vector_store %arg6[%c0_26, %c10, %c0_27], %49 {strides = array<i32>} : memref<2x32x16xf32, #tpu.memory_space<vmem>>, vector<2x1x16xf32>,
    %50 = vector.extract_strided_slice %5 {offsets = [0, 176], sizes = [2, 16], strides = [1, 1]} : vector<2x512xf32> to vector<2x16xf32>
    %c0_28 = arith.constant 0 : index
    %c11 = arith.constant 11 : index
    %c0_29 = arith.constant 0 : index
    %51 = vector.load %arg6[%c0_28, %c11, %c0_29] : memref<2x32x16xf32, #tpu.memory_space<vmem>>, vector<2x1x16xf32>
    %52 = vector.shape_cast %51 : vector<2x1x16xf32> to vector<2x16xf32>
    %53 = vector.shape_cast %50 : vector<2x16xf32> to vector<2x1x16xf32>
    tpu.vector_store %arg6[%c0_28, %c11, %c0_29], %53 {strides = array<i32>} : memref<2x32x16xf32, #tpu.memory_space<vmem>>, vector<2x1x16xf32>,
    %54 = vector.extract_strided_slice %5 {offsets = [0, 192], sizes = [2, 16], strides = [1, 1]} : vector<2x512xf32> to vector<2x16xf32>
    %c0_30 = arith.constant 0 : index
    %c12 = arith.constant 12 : index
    %c0_31 = arith.constant 0 : index
    %55 = vector.load %arg6[%c0_30, %c12, %c0_31] : memref<2x32x16xf32, #tpu.memory_space<vmem>>, vector<2x1x16xf32>
    %56 = vector.shape_cast %55 : vector<2x1x16xf32> to vector<2x16xf32>
    %57 = vector.shape_cast %54 : vector<2x16xf32> to vector<2x1x16xf32>
    tpu.vector_store %arg6[%c0_30, %c12, %c0_31], %57 {strides = array<i32>} : memref<2x32x16xf32, #tpu.memory_space<vmem>>, vector<2x1x16xf32>,
    %58 = vector.extract_strided_slice %5 {offsets = [0, 208], sizes = [2, 16], strides = [1, 1]} : vector<2x512xf32> to vector<2x16xf32>
    %c0_32 = arith.constant 0 : index
    %c13 = arith.constant 13 : index
    %c0_33 = arith.constant 0 : index
    %59 = vector.load %arg6[%c0_32, %c13, %c0_33] : memref<2x32x16xf32, #tpu.memory_space<vmem>>, vector<2x1x16xf32>
    %60 = vector.shape_cast %59 : vector<2x1x16xf32> to vector<2x16xf32>
    %61 = vector.shape_cast %58 : vector<2x16xf32> to vector<2x1x16xf32>
    tpu.vector_store %arg6[%c0_32, %c13, %c0_33], %61 {strides = array<i32>} : memref<2x32x16xf32, #tpu.memory_space<vmem>>, vector<2x1x16xf32>,
    %62 = vector.extract_strided_slice %5 {offsets = [0, 224], sizes = [2, 16], strides = [1, 1]} : vector<2x512xf32> to vector<2x16xf32>
    %c0_34 = arith.constant 0 : index
    %c14 = arith.constant 14 : index
    %c0_35 = arith.constant 0 : index
    %63 = vector.load %arg6[%c0_34, %c14, %c0_35] : memref<2x32x16xf32, #tpu.memory_space<vmem>>, vector<2x1x16xf32>
    %64 = vector.shape_cast %63 : vector<2x1x16xf32> to vector<2x16xf32>
    %65 = vector.shape_cast %62 : vector<2x16xf32> to vector<2x1x16xf32>
    tpu.vector_store %arg6[%c0_34, %c14, %c0_35], %65 {strides = array<i32>} : memref<2x32x16xf32, #tpu.memory_space<vmem>>, vector<2x1x16xf32>,
    %66 = vector.extract_strided_slice %5 {offsets = [0, 240], sizes = [2, 16], strides = [1, 1]} : vector<2x512xf32> to vector<2x16xf32>
    %c0_36 = arith.constant 0 : index
    %c15 = arith.constant 15 : index
    %c0_37 = arith.constant 0 : index
    %67 = vector.load %arg6[%c0_36, %c15, %c0_37] : memref<2x32x16xf32, #tpu.memory_space<vmem>>, vector<2x1x16xf32>
    %68 = vector.shape_cast %67 : vector<2x1x16xf32> to vector<2x16xf32>
    %69 = vector.shape_cast %66 : vector<2x16xf32> to vector<2x1x16xf32>
    tpu.vector_store %arg6[%c0_36, %c15, %c0_37], %69 {strides = array<i32>} : memref<2x32x16xf32, #tpu.memory_space<vmem>>, vector<2x1x16xf32>,
    %70 = vector.extract_strided_slice %5 {offsets = [0, 256], sizes = [2, 16], strides = [1, 1]} : vector<2x512xf32> to vector<2x16xf32>
    %c0_38 = arith.constant 0 : index
    %c16 = arith.constant 16 : index
    %c0_39 = arith.constant 0 : index
    %71 = vector.load %arg6[%c0_38, %c16, %c0_39] : memref<2x32x16xf32, #tpu.memory_space<vmem>>, vector<2x1x16xf32>
    %72 = vector.shape_cast %71 : vector<2x1x16xf32> to vector<2x16xf32>
    %73 = vector.shape_cast %70 : vector<2x16xf32> to vector<2x1x16xf32>
    tpu.vector_store %arg6[%c0_38, %c16, %c0_39], %73 {strides = array<i32>} : memref<2x32x16xf32, #tpu.memory_space<vmem>>, vector<2x1x16xf32>,
    %74 = vector.extract_strided_slice %5 {offsets = [0, 272], sizes = [2, 16], strides = [1, 1]} : vector<2x512xf32> to vector<2x16xf32>
    %c0_40 = arith.constant 0 : index
    %c17 = arith.constant 17 : index
    %c0_41 = arith.constant 0 : index
    %75 = vector.load %arg6[%c0_40, %c17, %c0_41] : memref<2x32x16xf32, #tpu.memory_space<vmem>>, vector<2x1x16xf32>
    %76 = vector.shape_cast %75 : vector<2x1x16xf32> to vector<2x16xf32>
    %77 = vector.shape_cast %74 : vector<2x16xf32> to vector<2x1x16xf32>
    tpu.vector_store %arg6[%c0_40, %c17, %c0_41], %77 {strides = array<i32>} : memref<2x32x16xf32, #tpu.memory_space<vmem>>, vector<2x1x16xf32>,
    %78 = vector.extract_strided_slice %5 {offsets = [0, 288], sizes = [2, 16], strides = [1, 1]} : vector<2x512xf32> to vector<2x16xf32>
    %c0_42 = arith.constant 0 : index
    %c18 = arith.constant 18 : index
    %c0_43 = arith.constant 0 : index
    %79 = vector.load %arg6[%c0_42, %c18, %c0_43] : memref<2x32x16xf32, #tpu.memory_space<vmem>>, vector<2x1x16xf32>
    %80 = vector.shape_cast %79 : vector<2x1x16xf32> to vector<2x16xf32>
    %81 = vector.shape_cast %78 : vector<2x16xf32> to vector<2x1x16xf32>
    tpu.vector_store %arg6[%c0_42, %c18, %c0_43], %81 {strides = array<i32>} : memref<2x32x16xf32, #tpu.memory_space<vmem>>, vector<2x1x16xf32>,
    %82 = vector.extract_strided_slice %5 {offsets = [0, 304], sizes = [2, 16], strides = [1, 1]} : vector<2x512xf32> to vector<2x16xf32>
    %c0_44 = arith.constant 0 : index
    %c19 = arith.constant 19 : index
    %c0_45 = arith.constant 0 : index
    %83 = vector.load %arg6[%c0_44, %c19, %c0_45] : memref<2x32x16xf32, #tpu.memory_space<vmem>>, vector<2x1x16xf32>
    %84 = vector.shape_cast %83 : vector<2x1x16xf32> to vector<2x16xf32>
    %85 = vector.shape_cast %82 : vector<2x16xf32> to vector<2x1x16xf32>
    tpu.vector_store %arg6[%c0_44, %c19, %c0_45], %85 {strides = array<i32>} : memref<2x32x16xf32, #tpu.memory_space<vmem>>, vector<2x1x16xf32>,
    %86 = vector.extract_strided_slice %5 {offsets = [0, 320], sizes = [2, 16], strides = [1, 1]} : vector<2x512xf32> to vector<2x16xf32>
    %c0_46 = arith.constant 0 : index
    %c20 = arith.constant 20 : index
    %c0_47 = arith.constant 0 : index
    %87 = vector.load %arg6[%c0_46, %c20, %c0_47] : memref<2x32x16xf32, #tpu.memory_space<vmem>>, vector<2x1x16xf32>
    %88 = vector.shape_cast %87 : vector<2x1x16xf32> to vector<2x16xf32>
    %89 = vector.shape_cast %86 : vector<2x16xf32> to vector<2x1x16xf32>
    tpu.vector_store %arg6[%c0_46, %c20, %c0_47], %89 {strides = array<i32>} : memref<2x32x16xf32, #tpu.memory_space<vmem>>, vector<2x1x16xf32>,
    %90 = vector.extract_strided_slice %5 {offsets = [0, 336], sizes = [2, 16], strides = [1, 1]} : vector<2x512xf32> to vector<2x16xf32>
    %c0_48 = arith.constant 0 : index
    %c21 = arith.constant 21 : index
    %c0_49 = arith.constant 0 : index
    %91 = vector.load %arg6[%c0_48, %c21, %c0_49] : memref<2x32x16xf32, #tpu.memory_space<vmem>>, vector<2x1x16xf32>
    %92 = vector.shape_cast %91 : vector<2x1x16xf32> to vector<2x16xf32>
    %93 = vector.shape_cast %90 : vector<2x16xf32> to vector<2x1x16xf32>
    tpu.vector_store %arg6[%c0_48, %c21, %c0_49], %93 {strides = array<i32>} : memref<2x32x16xf32, #tpu.memory_space<vmem>>, vector<2x1x16xf32>,
    %94 = vector.extract_strided_slice %5 {offsets = [0, 352], sizes = [2, 16], strides = [1, 1]} : vector<2x512xf32> to vector<2x16xf32>
    %c0_50 = arith.constant 0 : index
    %c22 = arith.constant 22 : index
    %c0_51 = arith.constant 0 : index
    %95 = vector.load %arg6[%c0_50, %c22, %c0_51] : memref<2x32x16xf32, #tpu.memory_space<vmem>>, vector<2x1x16xf32>
    %96 = vector.shape_cast %95 : vector<2x1x16xf32> to vector<2x16xf32>
    %97 = vector.shape_cast %94 : vector<2x16xf32> to vector<2x1x16xf32>
    tpu.vector_store %arg6[%c0_50, %c22, %c0_51], %97 {strides = array<i32>} : memref<2x32x16xf32, #tpu.memory_space<vmem>>, vector<2x1x16xf32>,
    %98 = vector.extract_strided_slice %5 {offsets = [0, 368], sizes = [2, 16], strides = [1, 1]} : vector<2x512xf32> to vector<2x16xf32>
    %c0_52 = arith.constant 0 : index
    %c23 = arith.constant 23 : index
    %c0_53 = arith.constant 0 : index
    %99 = vector.load %arg6[%c0_52, %c23, %c0_53] : memref<2x32x16xf32, #tpu.memory_space<vmem>>, vector<2x1x16xf32>
    %100 = vector.shape_cast %99 : vector<2x1x16xf32> to vector<2x16xf32>
    %101 = vector.shape_cast %98 : vector<2x16xf32> to vector<2x1x16xf32>
    tpu.vector_store %arg6[%c0_52, %c23, %c0_53], %101 {strides = array<i32>} : memref<2x32x16xf32, #tpu.memory_space<vmem>>, vector<2x1x16xf32>,
    %102 = vector.extract_strided_slice %5 {offsets = [0, 384], sizes = [2, 16], strides = [1, 1]} : vector<2x512xf32> to vector<2x16xf32>
    %c0_54 = arith.constant 0 : index
    %c24 = arith.constant 24 : index
    %c0_55 = arith.constant 0 : index
    %103 = vector.load %arg6[%c0_54, %c24, %c0_55] : memref<2x32x16xf32, #tpu.memory_space<vmem>>, vector<2x1x16xf32>
    %104 = vector.shape_cast %103 : vector<2x1x16xf32> to vector<2x16xf32>
    %105 = vector.shape_cast %102 : vector<2x16xf32> to vector<2x1x16xf32>
    tpu.vector_store %arg6[%c0_54, %c24, %c0_55], %105 {strides = array<i32>} : memref<2x32x16xf32, #tpu.memory_space<vmem>>, vector<2x1x16xf32>,
    %106 = vector.extract_strided_slice %5 {offsets = [0, 400], sizes = [2, 16], strides = [1, 1]} : vector<2x512xf32> to vector<2x16xf32>
    %c0_56 = arith.constant 0 : index
    %c25 = arith.constant 25 : index
    %c0_57 = arith.constant 0 : index
    %107 = vector.load %arg6[%c0_56, %c25, %c0_57] : memref<2x32x16xf32, #tpu.memory_space<vmem>>, vector<2x1x16xf32>
    %108 = vector.shape_cast %107 : vector<2x1x16xf32> to vector<2x16xf32>
    %109 = vector.shape_cast %106 : vector<2x16xf32> to vector<2x1x16xf32>
    tpu.vector_store %arg6[%c0_56, %c25, %c0_57], %109 {strides = array<i32>} : memref<2x32x16xf32, #tpu.memory_space<vmem>>, vector<2x1x16xf32>,
    %110 = vector.extract_strided_slice %5 {offsets = [0, 416], sizes = [2, 16], strides = [1, 1]} : vector<2x512xf32> to vector<2x16xf32>
    %c0_58 = arith.constant 0 : index
    %c26 = arith.constant 26 : index
    %c0_59 = arith.constant 0 : index
    %111 = vector.load %arg6[%c0_58, %c26, %c0_59] : memref<2x32x16xf32, #tpu.memory_space<vmem>>, vector<2x1x16xf32>
    %112 = vector.shape_cast %111 : vector<2x1x16xf32> to vector<2x16xf32>
    %113 = vector.shape_cast %110 : vector<2x16xf32> to vector<2x1x16xf32>
    tpu.vector_store %arg6[%c0_58, %c26, %c0_59], %113 {strides = array<i32>} : memref<2x32x16xf32, #tpu.memory_space<vmem>>, vector<2x1x16xf32>,
    %114 = vector.extract_strided_slice %5 {offsets = [0, 432], sizes = [2, 16], strides = [1, 1]} : vector<2x512xf32> to vector<2x16xf32>
    %c0_60 = arith.constant 0 : index
    %c27 = arith.constant 27 : index
    %c0_61 = arith.constant 0 : index
    %115 = vector.load %arg6[%c0_60, %c27, %c0_61] : memref<2x32x16xf32, #tpu.memory_space<vmem>>, vector<2x1x16xf32>
    %116 = vector.shape_cast %115 : vector<2x1x16xf32> to vector<2x16xf32>
    %117 = vector.shape_cast %114 : vector<2x16xf32> to vector<2x1x16xf32>
    tpu.vector_store %arg6[%c0_60, %c27, %c0_61], %117 {strides = array<i32>} : memref<2x32x16xf32, #tpu.memory_space<vmem>>, vector<2x1x16xf32>,
    %118 = vector.extract_strided_slice %5 {offsets = [0, 448], sizes = [2, 16], strides = [1, 1]} : vector<2x512xf32> to vector<2x16xf32>
    %c0_62 = arith.constant 0 : index
    %c28 = arith.constant 28 : index
    %c0_63 = arith.constant 0 : index
    %119 = vector.load %arg6[%c0_62, %c28, %c0_63] : memref<2x32x16xf32, #tpu.memory_space<vmem>>, vector<2x1x16xf32>
    %120 = vector.shape_cast %119 : vector<2x1x16xf32> to vector<2x16xf32>
    %121 = vector.shape_cast %118 : vector<2x16xf32> to vector<2x1x16xf32>
    tpu.vector_store %arg6[%c0_62, %c28, %c0_63], %121 {strides = array<i32>} : memref<2x32x16xf32, #tpu.memory_space<vmem>>, vector<2x1x16xf32>,
    %122 = vector.extract_strided_slice %5 {offsets = [0, 464], sizes = [2, 16], strides = [1, 1]} : vector<2x512xf32> to vector<2x16xf32>
    %c0_64 = arith.constant 0 : index
    %c29 = arith.constant 29 : index
    %c0_65 = arith.constant 0 : index
    %123 = vector.load %arg6[%c0_64, %c29, %c0_65] : memref<2x32x16xf32, #tpu.memory_space<vmem>>, vector<2x1x16xf32>
    %124 = vector.shape_cast %123 : vector<2x1x16xf32> to vector<2x16xf32>
    %125 = vector.shape_cast %122 : vector<2x16xf32> to vector<2x1x16xf32>
    tpu.vector_store %arg6[%c0_64, %c29, %c0_65], %125 {strides = array<i32>} : memref<2x32x16xf32, #tpu.memory_space<vmem>>, vector<2x1x16xf32>,
    %126 = vector.extract_strided_slice %5 {offsets = [0, 480], sizes = [2, 16], strides = [1, 1]} : vector<2x512xf32> to vector<2x16xf32>
    %c0_66 = arith.constant 0 : index
    %c30 = arith.constant 30 : index
    %c0_67 = arith.constant 0 : index
    %127 = vector.load %arg6[%c0_66, %c30, %c0_67] : memref<2x32x16xf32, #tpu.memory_space<vmem>>, vector<2x1x16xf32>
    %128 = vector.shape_cast %127 : vector<2x1x16xf32> to vector<2x16xf32>
    %129 = vector.shape_cast %126 : vector<2x16xf32> to vector<2x1x16xf32>
    tpu.vector_store %arg6[%c0_66, %c30, %c0_67], %129 {strides = array<i32>} : memref<2x32x16xf32, #tpu.memory_space<vmem>>, vector<2x1x16xf32>,
    %130 = vector.extract_strided_slice %5 {offsets = [0, 496], sizes = [2, 16], strides = [1, 1]} : vector<2x512xf32> to vector<2x16xf32>
    %c0_68 = arith.constant 0 : index
    %c31 = arith.constant 31 : index
    %c0_69 = arith.constant 0 : index
    %131 = vector.load %arg6[%c0_68, %c31, %c0_69] : memref<2x32x16xf32, #tpu.memory_space<vmem>>, vector<2x1x16xf32>
    %132 = vector.shape_cast %131 : vector<2x1x16xf32> to vector<2x16xf32>
    %133 = vector.shape_cast %130 : vector<2x16xf32> to vector<2x1x16xf32>
    tpu.vector_store %arg6[%c0_68, %c31, %c0_69], %133 {strides = array<i32>} : memref<2x32x16xf32, #tpu.memory_space<vmem>>, vector<2x1x16xf32>,
    %c0_70 = arith.constant 0 : index
    %c0_71 = arith.constant 0 : index
    %c0_72 = arith.constant 0 : index
    %134 = vector.load %arg6[%c0_70, %c0_71, %c0_72] : memref<2x32x16xf32, #tpu.memory_space<vmem>>, vector<2x32x16xf32>
    %135 = arith.truncf %134 : vector<2x32x16xf32> to vector<2x32x16xbf16>
    %c0_73 = arith.constant 0 : index
    %c0_74 = arith.constant 0 : index
    %c0_75 = arith.constant 0 : index
    %136 = vector.load %arg2[%c0_73, %c0_74, %c0_75] : memref<2x32x8xbf16, #tpu.memory_space<vmem>>, vector<2x32x8xbf16>
    %cst_76 = arith.constant dense<0.000000e+00> : vector<2x16x8xf32>
    %137 = tpu.matmul %135, %136, %cst_76 {dimension_numbers = #tpu.dot_dimension_numbers<[1], [1], [2], [2], [0, 0, 0, 2, 1, 2], [0], [0]>} : vector<2x32x16xbf16>, vector<2x32x8xbf16>, vector<2x16x8xf32> -> vector<2x16x8xf32>
    %cst_77 = arith.constant 0.000000e+00 : f32
    %138 = vector.broadcast %cst_77 : f32 to vector<2x16x8xf32>
    %139 = arith.cmpf oge, %137, %138 : vector<2x16x8xf32>
    %cst_78 = arith.constant 1.000000e-03 : f32
    %140 = vector.broadcast %cst_78 : f32 to vector<2x16x8xf32>
    %141 = arith.mulf %140, %137 : vector<2x16x8xf32>
    %142 = arith.select %139, %137, %141 : vector<2x16x8xi1>, vector<2x16x8xf32>
    %143 = vector.extract_strided_slice %142 {offsets = [0, 0, 0], sizes = [2, 1, 8], strides = [1, 1, 1]} : vector<2x16x8xf32> to vector<2x1x8xf32>
    %144 = vector.shape_cast %143 : vector<2x1x8xf32> to vector<2x8xf32>
    %c0_79 = arith.constant 0 : index
    %c0_80 = arith.constant 0 : index
    %145 = vector.load %arg5[%c0_79, %c0_80] : memref<2x128xf32, #tpu.memory_space<vmem>>, vector<2x8xf32>
    tpu.vector_store %arg5[%c0_79, %c0_80], %144 {strides = array<i32>} : memref<2x128xf32, #tpu.memory_space<vmem>>, vector<2x8xf32>,
    %146 = vector.extract_strided_slice %142 {offsets = [0, 1, 0], sizes = [2, 1, 8], strides = [1, 1, 1]} : vector<2x16x8xf32> to vector<2x1x8xf32>
    %147 = vector.shape_cast %146 : vector<2x1x8xf32> to vector<2x8xf32>
    %c0_81 = arith.constant 0 : index
    %c8_82 = arith.constant 8 : index
    %148 = vector.load %arg5[%c0_81, %c8_82] : memref<2x128xf32, #tpu.memory_space<vmem>>, vector<2x8xf32>
    tpu.vector_store %arg5[%c0_81, %c8_82], %147 {strides = array<i32>} : memref<2x128xf32, #tpu.memory_space<vmem>>, vector<2x8xf32>,
    %149 = vector.extract_strided_slice %142 {offsets = [0, 2, 0], sizes = [2, 1, 8], strides = [1, 1, 1]} : vector<2x16x8xf32> to vector<2x1x8xf32>
    %150 = vector.shape_cast %149 : vector<2x1x8xf32> to vector<2x8xf32>
    %c0_83 = arith.constant 0 : index
    %c16_84 = arith.constant 16 : index
    %151 = vector.load %arg5[%c0_83, %c16_84] : memref<2x128xf32, #tpu.memory_space<vmem>>, vector<2x8xf32>
    tpu.vector_store %arg5[%c0_83, %c16_84], %150 {strides = array<i32>} : memref<2x128xf32, #tpu.memory_space<vmem>>, vector<2x8xf32>,
    %152 = vector.extract_strided_slice %142 {offsets = [0, 3, 0], sizes = [2, 1, 8], strides = [1, 1, 1]} : vector<2x16x8xf32> to vector<2x1x8xf32>
    %153 = vector.shape_cast %152 : vector<2x1x8xf32> to vector<2x8xf32>
    %c0_85 = arith.constant 0 : index
    %c24_86 = arith.constant 24 : index
    %154 = vector.load %arg5[%c0_85, %c24_86] : memref<2x128xf32, #tpu.memory_space<vmem>>, vector<2x8xf32>
    tpu.vector_store %arg5[%c0_85, %c24_86], %153 {strides = array<i32>} : memref<2x128xf32, #tpu.memory_space<vmem>>, vector<2x8xf32>,
    %155 = vector.extract_strided_slice %142 {offsets = [0, 4, 0], sizes = [2, 1, 8], strides = [1, 1, 1]} : vector<2x16x8xf32> to vector<2x1x8xf32>
    %156 = vector.shape_cast %155 : vector<2x1x8xf32> to vector<2x8xf32>
    %c0_87 = arith.constant 0 : index
    %c32 = arith.constant 32 : index
    %157 = vector.load %arg5[%c0_87, %c32] : memref<2x128xf32, #tpu.memory_space<vmem>>, vector<2x8xf32>
    tpu.vector_store %arg5[%c0_87, %c32], %156 {strides = array<i32>} : memref<2x128xf32, #tpu.memory_space<vmem>>, vector<2x8xf32>,
    %158 = vector.extract_strided_slice %142 {offsets = [0, 5, 0], sizes = [2, 1, 8], strides = [1, 1, 1]} : vector<2x16x8xf32> to vector<2x1x8xf32>
    %159 = vector.shape_cast %158 : vector<2x1x8xf32> to vector<2x8xf32>
    %c0_88 = arith.constant 0 : index
    %c40 = arith.constant 40 : index
    %160 = vector.load %arg5[%c0_88, %c40] : memref<2x128xf32, #tpu.memory_space<vmem>>, vector<2x8xf32>
    tpu.vector_store %arg5[%c0_88, %c40], %159 {strides = array<i32>} : memref<2x128xf32, #tpu.memory_space<vmem>>, vector<2x8xf32>,
    %161 = vector.extract_strided_slice %142 {offsets = [0, 6, 0], sizes = [2, 1, 8], strides = [1, 1, 1]} : vector<2x16x8xf32> to vector<2x1x8xf32>
    %162 = vector.shape_cast %161 : vector<2x1x8xf32> to vector<2x8xf32>
    %c0_89 = arith.constant 0 : index
    %c48 = arith.constant 48 : index
    %163 = vector.load %arg5[%c0_89, %c48] : memref<2x128xf32, #tpu.memory_space<vmem>>, vector<2x8xf32>
    tpu.vector_store %arg5[%c0_89, %c48], %162 {strides = array<i32>} : memref<2x128xf32, #tpu.memory_space<vmem>>, vector<2x8xf32>,
    %164 = vector.extract_strided_slice %142 {offsets = [0, 7, 0], sizes = [2, 1, 8], strides = [1, 1, 1]} : vector<2x16x8xf32> to vector<2x1x8xf32>
    %165 = vector.shape_cast %164 : vector<2x1x8xf32> to vector<2x8xf32>
    %c0_90 = arith.constant 0 : index
    %c56 = arith.constant 56 : index
    %166 = vector.load %arg5[%c0_90, %c56] : memref<2x128xf32, #tpu.memory_space<vmem>>, vector<2x8xf32>
    tpu.vector_store %arg5[%c0_90, %c56], %165 {strides = array<i32>} : memref<2x128xf32, #tpu.memory_space<vmem>>, vector<2x8xf32>,
    %167 = vector.extract_strided_slice %142 {offsets = [0, 8, 0], sizes = [2, 1, 8], strides = [1, 1, 1]} : vector<2x16x8xf32> to vector<2x1x8xf32>
    %168 = vector.shape_cast %167 : vector<2x1x8xf32> to vector<2x8xf32>
    %c0_91 = arith.constant 0 : index
    %c64 = arith.constant 64 : index
    %169 = vector.load %arg5[%c0_91, %c64] : memref<2x128xf32, #tpu.memory_space<vmem>>, vector<2x8xf32>
    tpu.vector_store %arg5[%c0_91, %c64], %168 {strides = array<i32>} : memref<2x128xf32, #tpu.memory_space<vmem>>, vector<2x8xf32>,
    %170 = vector.extract_strided_slice %142 {offsets = [0, 9, 0], sizes = [2, 1, 8], strides = [1, 1, 1]} : vector<2x16x8xf32> to vector<2x1x8xf32>
    %171 = vector.shape_cast %170 : vector<2x1x8xf32> to vector<2x8xf32>
    %c0_92 = arith.constant 0 : index
    %c72 = arith.constant 72 : index
    %172 = vector.load %arg5[%c0_92, %c72] : memref<2x128xf32, #tpu.memory_space<vmem>>, vector<2x8xf32>
    tpu.vector_store %arg5[%c0_92, %c72], %171 {strides = array<i32>} : memref<2x128xf32, #tpu.memory_space<vmem>>, vector<2x8xf32>,
    %173 = vector.extract_strided_slice %142 {offsets = [0, 10, 0], sizes = [2, 1, 8], strides = [1, 1, 1]} : vector<2x16x8xf32> to vector<2x1x8xf32>
    %174 = vector.shape_cast %173 : vector<2x1x8xf32> to vector<2x8xf32>
    %c0_93 = arith.constant 0 : index
    %c80 = arith.constant 80 : index
    %175 = vector.load %arg5[%c0_93, %c80] : memref<2x128xf32, #tpu.memory_space<vmem>>, vector<2x8xf32>
    tpu.vector_store %arg5[%c0_93, %c80], %174 {strides = array<i32>} : memref<2x128xf32, #tpu.memory_space<vmem>>, vector<2x8xf32>,
    %176 = vector.extract_strided_slice %142 {offsets = [0, 11, 0], sizes = [2, 1, 8], strides = [1, 1, 1]} : vector<2x16x8xf32> to vector<2x1x8xf32>
    %177 = vector.shape_cast %176 : vector<2x1x8xf32> to vector<2x8xf32>
    %c0_94 = arith.constant 0 : index
    %c88 = arith.constant 88 : index
    %178 = vector.load %arg5[%c0_94, %c88] : memref<2x128xf32, #tpu.memory_space<vmem>>, vector<2x8xf32>
    tpu.vector_store %arg5[%c0_94, %c88], %177 {strides = array<i32>} : memref<2x128xf32, #tpu.memory_space<vmem>>, vector<2x8xf32>,
    %179 = vector.extract_strided_slice %142 {offsets = [0, 12, 0], sizes = [2, 1, 8], strides = [1, 1, 1]} : vector<2x16x8xf32> to vector<2x1x8xf32>
    %180 = vector.shape_cast %179 : vector<2x1x8xf32> to vector<2x8xf32>
    %c0_95 = arith.constant 0 : index
    %c96 = arith.constant 96 : index
    %181 = vector.load %arg5[%c0_95, %c96] : memref<2x128xf32, #tpu.memory_space<vmem>>, vector<2x8xf32>
    tpu.vector_store %arg5[%c0_95, %c96], %180 {strides = array<i32>} : memref<2x128xf32, #tpu.memory_space<vmem>>, vector<2x8xf32>,
    %182 = vector.extract_strided_slice %142 {offsets = [0, 13, 0], sizes = [2, 1, 8], strides = [1, 1, 1]} : vector<2x16x8xf32> to vector<2x1x8xf32>
    %183 = vector.shape_cast %182 : vector<2x1x8xf32> to vector<2x8xf32>
    %c0_96 = arith.constant 0 : index
    %c104 = arith.constant 104 : index
    %184 = vector.load %arg5[%c0_96, %c104] : memref<2x128xf32, #tpu.memory_space<vmem>>, vector<2x8xf32>
    tpu.vector_store %arg5[%c0_96, %c104], %183 {strides = array<i32>} : memref<2x128xf32, #tpu.memory_space<vmem>>, vector<2x8xf32>,
    %185 = vector.extract_strided_slice %142 {offsets = [0, 14, 0], sizes = [2, 1, 8], strides = [1, 1, 1]} : vector<2x16x8xf32> to vector<2x1x8xf32>
    %186 = vector.shape_cast %185 : vector<2x1x8xf32> to vector<2x8xf32>
    %c0_97 = arith.constant 0 : index
    %c112 = arith.constant 112 : index
    %187 = vector.load %arg5[%c0_97, %c112] : memref<2x128xf32, #tpu.memory_space<vmem>>, vector<2x8xf32>
    tpu.vector_store %arg5[%c0_97, %c112], %186 {strides = array<i32>} : memref<2x128xf32, #tpu.memory_space<vmem>>, vector<2x8xf32>,
    %188 = vector.extract_strided_slice %142 {offsets = [0, 15, 0], sizes = [2, 1, 8], strides = [1, 1, 1]} : vector<2x16x8xf32> to vector<2x1x8xf32>
    %189 = vector.shape_cast %188 : vector<2x1x8xf32> to vector<2x8xf32>
    %c0_98 = arith.constant 0 : index
    %c120 = arith.constant 120 : index
    %190 = vector.load %arg5[%c0_98, %c120] : memref<2x128xf32, #tpu.memory_space<vmem>>, vector<2x8xf32>
    tpu.vector_store %arg5[%c0_98, %c120], %189 {strides = array<i32>} : memref<2x128xf32, #tpu.memory_space<vmem>>, vector<2x8xf32>,
    return
  }
  func.func @transform_0(%arg0: i32) -> (i32, i32) {
    %c0_i32 = arith.constant 0 : i32
    %c0_i32_0 = arith.constant 0 : i32
    return %arg0, %c0_i32 : i32, i32
  }
  func.func @transform_1(%arg0: i32) -> (i32, i32, i32) {
    %c0_i32 = arith.constant 0 : i32
    %c0_i32_0 = arith.constant 0 : i32
    %c0_i32_1 = arith.constant 0 : i32
    return %arg0, %c0_i32, %c0_i32_0 : i32, i32, i32
  }
  func.func @transform_2(%arg0: i32) -> (i32, i32) {
    %c0_i32 = arith.constant 0 : i32
    %c0_i32_0 = arith.constant 0 : i32
    %c0_i32_1 = arith.constant 0 : i32
    return %c0_i32, %c0_i32_0 : i32, i32
  }
  func.func @transform_3(%arg0: i32) -> (i32, i32) {
    %c0_i32 = arith.constant 0 : i32
    %c0_i32_0 = arith.constant 0 : i32
    %c0_i32_1 = arith.constant 0 : i32
    return %c0_i32, %c0_i32_0 : i32, i32
  }
  func.func @transform_4(%arg0: i32) -> (i32, i32) {
    %c0_i32 = arith.constant 0 : i32
    %c0_i32_0 = arith.constant 0 : i32
    return %arg0, %c0_i32 : i32, i32
  }
}

</mosaic_0001>

<bundles_post_ra>
// kernel: tpu_custom_call.1
= control target key start
LH: loop header
LB: loop body
LE: loop exit
PB: predicated region body
PF: predicated region fallthrough
CT: control target
= control target key end

     0   :  { %9 = vsyncpa [#allocation4], 0  ;;  %s1730_s0 = inlined_call_operand.vmem [shape: bf16[2,256], index: 0, kind: input, shape index: {}]   ;;  %s1731_s1 = inlined_call_operand.vmem [shape: bf16[2,32,8], index: 1, kind: input, shape index: {}]   ;;  %s1732_s2 = inlined_call_operand.hbm [shape: bf16[512,256], index: 2, kind: input, shape index: {}]   ;;  %s1733_s3 = inlined_call_operand.vmem [shape: f32[1,512], index: 3, kind: input, shape index: {}]   ;;  %s1734_s4 = inlined_call_operand.hbm [shape: f32[2,128], index: 4, kind: output, shape index: {}]  }
   0x1   :  { %10 = vsyncpa [#allocation5], 0  ;;  %s1478_s15 = smov [#allocation3]  }
   0x2   :  { %s20_s16 = sshll.u32 %s1478_s15, 4  ;;  %s21_s16 = int_to_ptr.vmem [resolvable:$true] %s20_s16 }
   0x3   :  { %s1442_s17 = scalar_lea.vmem %s21_s16, 8192  ;;  %p1447_p1 = scmp.lt.s32.totalorder %s21_s16, %s21_s16 }
   0x4   :  { %p1443_p0 = scmp.ne.s32.totalorder %s21_s16, %s1442_s17  ;;  %p1448_p2 = scmp.lt.s32.totalorder %s1442_s17, %s1442_s17 }
   0x6   :  { %p1449_p3 = por %p1448_p2, %p1447_p1 }
   0x8   :  { %p1450_p4 = pnand %p1449_p3, %p1443_p0 }
   0xa   :  { %1453 = shalt.err (!%p1450_p4)
}
   0xb   :  { %s1479_s18 = smov 128   ;;  %s1480_s19 = smov 8  }
   0xc   :  { %26 = dma.hbm_to_vmem [thread:$0]  %s1732_s2, 8192, %s21_s16, [#allocation4], %s1479_s18, %s1479_s18, %s1480_s19  }
   0xd   :  { %1474 = dma.done.wait [#allocation4], 8192  }
   0xe   :  { %1475 = vsyncadd [#allocation4], 4294959104  ;;  %v1334_v0 = vld [vmem:[#allocation3 + $0x74] ss:$8 sps:$4 sm:$0xff]   ;;  %v1336_v1 = vld [vmem:[#allocation3 + $0x70] ss:$8 sps:$4 sm:$0xff]   ;;  %v100_v21 = vlaneseq }
   0xf   :  { %465 = vmatprep.subr.bf16.mxu0 %v1334_v0  ;;  %v1337_v2 = vld [vmem:[#allocation3 + $0x174] ss:$8 sps:$4 sm:$0xff]   ;;  %v1339_v3 = vld [vmem:[#allocation3 + $0x170] ss:$8 sps:$4 sm:$0xff]   ;;  %v1340_v4 = vld [vmem:[#allocation3 + $0x64] ss:$8 sps:$4 sm:$0xff]  }
  0x10   :  { %466 = vmatpush1.bf16.xpose.msra.mxu0 %v1336_v1  ;;  %506 = vmatprep.subr.bf16.mxu1 %v1337_v2  ;;  %v1343_v5 = vld [vmem:[#allocation3 + $0x164] ss:$8 sps:$4 sm:$0xff]   ;;  %v1342_v6 = vld [vmem:[#allocation3 + $0x60] ss:$8 sps:$4 sm:$0xff]   ;;  %v1346_v7 = vld [vmem:[#allocation3 + $0x54] ss:$8 sps:$4 sm:$0xff]  }
  0x11   :  { %507 = vmatpush1.bf16.xpose.msra.mxu1 %v1339_v3  ;;  %467 = vmatprep.subr.bf16.mxu0 %v1340_v4  ;;  %v1345_v8 = vld [vmem:[#allocation3 + $0x160] ss:$8 sps:$4 sm:$0xff]   ;;  %v1349_v9 = vld [vmem:[#allocation3 + $0x154] ss:$8 sps:$4 sm:$0xff]   ;;  %v1348_v10 = vld [vmem:[#allocation3 + $0x50] ss:$8 sps:$4 sm:$0xff]  }
  0x12   :  { %508 = vmatprep.subr.bf16.mxu1 %v1343_v5  ;;  %v1352_v11 = vld [vmem:[#allocation3 + $0x44] ss:$8 sps:$4 sm:$0xff]   ;;  %v1351_v12 = vld [vmem:[#allocation3 + $0x150] ss:$8 sps:$4 sm:$0xff]   ;;  %v1354_v14 = vld [vmem:[#allocation3 + $0x40] ss:$8 sps:$4 sm:$0xff]  }
  0x13   :  { %v1355_v13 = vld [vmem:[#allocation3 + $0x144] ss:$8 sps:$4 sm:$0xff]   ;;  %v1358_v15 = vld [vmem:[#allocation3 + $0x34] ss:$8 sps:$4 sm:$0xff]   ;;  %v1357_v16 = vld [vmem:[#allocation3 + $0x140] ss:$8 sps:$4 sm:$0xff]  }
  0x14   :  { %v1361_v17 = vld [vmem:[#allocation3 + $0x134] ss:$8 sps:$4 sm:$0xff]   ;;  %v1360_v18 = vld [vmem:[#allocation3 + $0x30] ss:$8 sps:$4 sm:$0xff]   ;;  %v1364_v19 = vld [vmem:[#allocation3 + $0x24] ss:$8 sps:$4 sm:$0xff]  }
  0x15   :  { %v1363_v20 = vld [vmem:[#allocation3 + $0x130] ss:$8 sps:$4 sm:$0xff]   ;;  %v1481_v22 = vmov 1966171168   ;;  %v1367_v24 = vld [vmem:[#allocation3 + $0x124] ss:$8 sps:$4 sm:$0xff]  }
  0x16   :  { %v130_v23 = vunpack.c.l.s4 %v1481_v22  ;;  %v1528_v25 = vshrl.u32 %v100_v21, 7  ;;  %v1366_v27 = vld [vmem:[#allocation3 + $0x20] ss:$8 sps:$4 sm:$0xff]   ;;  %v1370_v28 = vld [vmem:[#allocation3 + $0x14] ss:$8 sps:$4 sm:$0xff]   ;;  %vm572_vm0 = vcmask 122880  }
  0x17   :  { %v1369_v29 = vld [vmem:[#allocation3 + $0x120] ss:$8 sps:$4 sm:$0xff]   ;;  %v1373_v31 = vld [vmem:[#allocation3 + $0x114] ss:$8 sps:$4 sm:$0xff]   ;;  %v1372_v35 = vld [vmem:[#allocation3 + $0x10] ss:$8 sps:$4 sm:$0xff]  }
  0x18   :  { %468 = vmatpush1.bf16.xpose.msra.mxu0 %v1342_v6  ;;  %v131_v26 = vunpack.c.0.s8 %v130_v23  ;;  %v1536_v32 = vld.sshfl [vmem:[%s1730_s0] sm:$0x11 pattern:$0x75316420]  ;;  %v1376_v36 = vld [vmem:[#allocation3 + $0x4] ss:$8 sps:$4 sm:$0xff]  }
  0x19   :  { %469 = vmatprep.subr.bf16.mxu0 %v1346_v7  ;;  %509 = vmatpush1.bf16.xpose.msra.mxu1 %v1345_v8  ;;  %v128_v33 = vcombine.high %v1536_v32, %v1536_v32  ;;  %v1375_v37 = vld [vmem:[#allocation3 + $0x110] ss:$8 sps:$4 sm:$0xff]   ;;  %v1379_v38 = vld [vmem:[#allocation3 + $0x104] ss:$8 sps:$4 sm:$0xff]   ;;  %v1378_v39 = vld [vmem:[#allocation3] ss:$8 sps:$4 sm:$0xff]  }
  0x1a   :  { %510 = vmatprep.subr.bf16.mxu1 %v1349_v9  ;;  %v1531_v30 = vsub.s32 %v131_v26, %v1528_v25  ;;  %v1382_v40 = vld [vmem:[#allocation3 + $0xf4] ss:$8 sps:$4 sm:$0xff]   ;;  %v1381_v41 = vld [vmem:[#allocation3 + $0x100] ss:$8 sps:$4 sm:$0xff]   ;;  %v1384_v43 = vld [vmem:[#allocation3 + $0xf0] ss:$8 sps:$4 sm:$0xff]  }
  0x1b   :  { %v1385_v42 = vld [vmem:[#allocation3 + $0x1f4] ss:$8 sps:$4 sm:$0xff]   ;;  %v1388_v44 = vld [vmem:[#allocation3 + $0xe4] ss:$8 sps:$4 sm:$0xff]   ;;  %v1387_v45 = vld [vmem:[#allocation3 + $0x1f0] ss:$8 sps:$4 sm:$0xff]  }
  0x1c   :  { %v142_v34 = vrot.slane %v128_v33, %v1531_v30  ;;  %v1391_v46 = vld [vmem:[#allocation3 + $0x1e4] ss:$8 sps:$4 sm:$0xff]   ;;  %v1390_v47 = vld [vmem:[#allocation3 + $0xe0] ss:$8 sps:$4 sm:$0xff]   ;;  %v1394_v48 = vld [vmem:[#allocation3 + $0xd4] ss:$8 sps:$4 sm:$0xff]   ;;  %v135_v9 = vrot.slane %v1536_v32, %v1531_v30 }
  0x1d   :  { %v1393_v49 = vld [vmem:[#allocation3 + $0x1e0] ss:$8 sps:$4 sm:$0xff]   ;;  %v1397_v50 = vld [vmem:[#allocation3 + $0x1d4] ss:$8 sps:$4 sm:$0xff]   ;;  %v1396_v51 = vld [vmem:[#allocation3 + $0xd0] ss:$8 sps:$4 sm:$0xff]  }
  0x1e   :  { %497 = vmatprep.mubr.bf16.mxu0 %v142_v34  ;;  %538 = vmatprep.mubr.bf16.mxu1 %v142_v34  ;;  %v1400_v52 = vld [vmem:[#allocation3 + $0xc4] ss:$8 sps:$4 sm:$0xff]   ;;  %v1399_v53 = vld [vmem:[#allocation3 + $0x1d0] ss:$8 sps:$4 sm:$0xff]   ;;  %v1402_v55 = vld [vmem:[#allocation3 + $0xc0] ss:$8 sps:$4 sm:$0xff]  }
  0x1f   :  { %v1403_v54 = vld [vmem:[#allocation3 + $0x1c4] ss:$8 sps:$4 sm:$0xff]   ;;  %v1406_v56 = vld [vmem:[#allocation3 + $0xb4] ss:$8 sps:$4 sm:$0xff]   ;;  %v1405_v57 = vld [vmem:[#allocation3 + $0x1c0] ss:$8 sps:$4 sm:$0xff]  }
  0x20   :  { %470 = vmatpush1.bf16.xpose.msra.mxu0 %v1348_v10  ;;  %v1409_v58 = vld [vmem:[#allocation3 + $0x1b4] ss:$8 sps:$4 sm:$0xff]   ;;  %v1408_v59 = vld [vmem:[#allocation3 + $0xb0] ss:$8 sps:$4 sm:$0xff]   ;;  %v1412_v60 = vld [vmem:[#allocation3 + $0xa4] ss:$8 sps:$4 sm:$0xff]  }
  0x21   :  { %471 = vmatprep.subr.bf16.mxu0 %v1352_v11  ;;  %511 = vmatpush1.bf16.xpose.msra.mxu1 %v1351_v12  ;;  %v1411_v61 = vld [vmem:[#allocation3 + $0x1b0] ss:$8 sps:$4 sm:$0xff]   ;;  %v1415_v62 = vld [vmem:[#allocation3 + $0x1a4] ss:$8 sps:$4 sm:$0xff]   ;;  %v1414_v63 = vld [vmem:[#allocation3 + $0xa0] ss:$8 sps:$4 sm:$0xff]  }
  0x22   :  { %512 = vmatprep.subr.bf16.mxu1 %v1355_v13  ;;  %v1418_v0 = vld [vmem:[#allocation3 + $0x94] ss:$8 sps:$4 sm:$0xff]   ;;  %v1417_v1 = vld [vmem:[#allocation3 + $0x1a0] ss:$8 sps:$4 sm:$0xff]   ;;  %v1420_v3 = vld [vmem:[#allocation3 + $0x90] ss:$8 sps:$4 sm:$0xff]  }
  0x23   :  { %v1421_v2 = vld [vmem:[#allocation3 + $0x194] ss:$8 sps:$4 sm:$0xff]   ;;  %v1424_v4 = vld [vmem:[#allocation3 + $0x84] ss:$8 sps:$4 sm:$0xff]   ;;  %v1423_v5 = vld [vmem:[#allocation3 + $0x190] ss:$8 sps:$4 sm:$0xff]  }
  0x24   :  { %v1427_v6 = vld [vmem:[#allocation3 + $0x184] ss:$8 sps:$4 sm:$0xff]   ;;  %v1426_v7 = vld [vmem:[#allocation3 + $0x80] ss:$8 sps:$4 sm:$0xff]   ;;  %v1544_v10 = vsub.s32 0, %v1528_v25  ;;  %v106_v12 = vsub.s32 1, %v1528_v25 }
  0x25   :  { %v1429_v8 = vld [vmem:[#allocation3 + $0x180] ss:$8 sps:$4 sm:$0xff]   ;;  %v110_v13 = vsub.s32 2, %v1528_v25  ;;  %s1483_s24 = smov 112   ;;  %s1484_s25 = smov 64   ;;  %vm1490_vm1 = vmmov 0  }
  0x26   :  { %v98_v11 = vld [vmem:[%s1733_s3] sm:$0xf]  ;;  %s1482_s3 = smov 96   ;;  %s1485_s26 = smov 80   ;;  %vm960_vm2 = vcmask 261120   ;;  %vm1104_vm5 = vcmask 1043459  }
  0x27   :  { %s1486_s27 = smov 32   ;;  %s1487_s28 = smov 48   ;;  %vm1092_vm6 = vcmask 1041409   ;;  %vm1097_vm7 = vcmask 1042434   ;;  %vm1095_vm8 = vcmask 58368   ;;  %vm1118_vm9 = vcmask 1045509  }
  0x28   :  { %472 = vmatpush1.bf16.xpose.msra.mxu0 %v1354_v14  ;;  %v103_v14 = vrot.slane %v98_v11, %v1544_v10  ;;  %s1488_s29 = smov 16   ;;  %vm1111_vm10 = vcmask 1044484   ;;  %vm1132_vm12 = vcmask 1047559   ;;  %s1492_s12 = smov 24   ;;  %vm1125_vm14 = vcmask 1046534  }
  0x29   :  { %473 = vmatprep.subr.bf16.mxu0 %v1358_v15  ;;  %513 = vmatpush1.bf16.xpose.msra.mxu1 %v1357_v16  ;;  %v114_v15 = vsub.s32 3, %v1528_v25  ;;  %v107_v16 = vrot.slane %v98_v11, %v106_v12  ;;  %s1493_s13 = smov 40   ;;  %s1494_s14 = smov 72   ;;  %vm1102_vm15 = vcmask 124993  }
  0x2a   :  { %514 = vmatprep.subr.bf16.mxu1 %v1361_v17  ;;  %v111_v17 = vrot.slane %v98_v11, %v110_v13  ;;  %s1495_s15 = smov 88   ;;  %s1496_s16 = smov 104  }
  0x2b   :  { %v115_v22 = vrot.slane %v98_v11, %v114_v15  ;;  %s1497_s17 = smov 120   ;;  %s1498_s18 = smov [#allocation6]  }
  0x30   :  { %474 = vmatpush1.bf16.xpose.msra.mxu0 %v1360_v18 }
  0x31   :  { %475 = vmatprep.subr.bf16.mxu0 %v1364_v19  ;;  %515 = vmatpush1.bf16.xpose.msra.mxu1 %v1363_v20 }
  0x32   :  { %516 = vmatprep.subr.bf16.mxu1 %v1367_v24 }
  0x38   :  { %476 = vmatpush1.bf16.xpose.msra.mxu0 %v1366_v27 }
  0x39   :  { %477 = vmatprep.subr.bf16.mxu0 %v1370_v28  ;;  %517 = vmatpush1.bf16.xpose.msra.mxu1 %v1369_v29 }
  0x3a   :  { %518 = vmatprep.subr.bf16.mxu1 %v1373_v31 }
  0x40   :  { %478 = vmatpush1.bf16.xpose.msra.mxu0 %v1372_v35 }
  0x41   :  { %479 = vmatprep.subr.bf16.mxu0 %v1376_v36  ;;  %519 = vmatpush1.bf16.xpose.msra.mxu1 %v1375_v37 }
  0x42   :  { %520 = vmatprep.subr.bf16.mxu1 %v1379_v38 }
  0x48   :  { %480 = vmatpush1.bf16.xpose.msra.mxu0 %v1378_v39 }
  0x49   :  { %481 = vmatprep.subr.bf16.mxu0 %v1382_v40  ;;  %521 = vmatpush1.bf16.xpose.msra.mxu1 %v1381_v41 }
  0x4a   :  { %522 = vmatprep.subr.bf16.mxu1 %v1385_v42 }
  0x50   :  { %482 = vmatpush2.bf16.xpose.msra.mxu0 %v1384_v43 }
  0x51   :  { %483 = vmatprep.subr.bf16.mxu0 %v1388_v44  ;;  %523 = vmatpush2.bf16.xpose.msra.mxu1 %v1387_v45 }
  0x52   :  { %524 = vmatprep.subr.bf16.mxu1 %v1391_v46 }
  0x58   :  { %484 = vmatpush2.bf16.xpose.msra.mxu0 %v1390_v47 }
  0x59   :  { %485 = vmatprep.subr.bf16.mxu0 %v1394_v48  ;;  %525 = vmatpush2.bf16.xpose.msra.mxu1 %v1393_v49 }
  0x5a   :  { %526 = vmatprep.subr.bf16.mxu1 %v1397_v50 }
  0x60   :  { %486 = vmatpush2.bf16.xpose.msra.mxu0 %v1396_v51 }
  0x61   :  { %487 = vmatprep.subr.bf16.mxu0 %v1400_v52  ;;  %527 = vmatpush2.bf16.xpose.msra.mxu1 %v1399_v53 }
  0x62   :  { %528 = vmatprep.subr.bf16.mxu1 %v1403_v54 }
  0x68   :  { %488 = vmatpush2.bf16.xpose.msra.mxu0 %v1402_v55  ;;  %v1430_v55 = vld [vmem:[%s1731_s1 + $0x18] sm:$0xff]  }
  0x69   :  { %489 = vmatprep.subr.bf16.mxu0 %v1406_v56  ;;  %529 = vmatpush2.bf16.xpose.msra.mxu1 %v1405_v57  ;;  %v1431_v56 = vld [vmem:[%s1731_s1 + $0x8] sm:$0xff]   ;;  %v1489_v57 = vmov 0.0  }
  0x6a   :  { %530 = vmatprep.subr.bf16.mxu1 %v1409_v58  ;;  %v1432_v58 = vld [vmem:[%s1731_s1 + $0x10] sm:$0xff]  }
  0x70   :  { %490 = vmatpush2.bf16.xpose.msra.mxu0 %v1408_v59 }
  0x71   :  { %491 = vmatprep.subr.bf16.mxu0 %v1412_v60  ;;  %531 = vmatpush2.bf16.xpose.msra.mxu1 %v1411_v61 }
  0x72   :  { %532 = vmatprep.subr.bf16.mxu1 %v1415_v62 }
  0x78   :  { %492 = vmatpush2.bf16.xpose.msra.mxu0 %v1414_v63 }
  0x79   :  { %493 = vmatprep.subr.bf16.mxu0 %v1418_v0  ;;  %533 = vmatpush2.bf16.xpose.msra.mxu1 %v1417_v1 }
  0x7a   :  { %534 = vmatprep.subr.bf16.mxu1 %v1421_v2 }
  0x80   :  { %494 = vmatpush2.bf16.xpose.msra.mxu0 %v1420_v3 }
  0x81   :  { %495 = vmatprep.subr.bf16.mxu0 %v1424_v4  ;;  %535 = vmatpush2.bf16.xpose.msra.mxu1 %v1423_v5 }
  0x82   :  { %536 = vmatprep.subr.bf16.mxu1 %v1427_v6 }
  0x88   :  { %496 = vmatpush2.bf16.xpose.msra.mxu0 %v1426_v7 }
  0x89   :  { %537 = vmatpush2.bf16.xpose.msra.mxu1 %v1429_v8  ;;  %1296 = vmatprep.subr.bf16.mxu0 %v1489_v57 }
  0x8a   :  { %1304 = vmatprep.subr.bf16.mxu1 %v1489_v57 }
  0x8f   :  { %498 = vmatmul.mubr.bf16.vlgmr.msra.gmra.mxu0 %v135_v9 }
  0x90   :  { %539 = vmatmul.mubr.bf16.vlgmr.msra.gmra.mxu1 %v135_v9  ;;  %1297 = vmatpush3.bf16.msra.mxu0 %v1431_v56 }
  0x91   :  { %1305 = vmatpush3.bf16.msra.mxu1 %v1430_v55  ;;  %1298 = vmatprep.subr.bf16.mxu0 %v1489_v57 }
  0x92   :  { %1306 = vmatprep.subr.bf16.mxu1 %v1489_v57  ;;  %1308 = vmatprep.mubr.msk.bf16.mxu1 %vm1490_vm1, %v1489_v57 }
  0x93   :  { %1300 = vmatprep.mubr.msk.bf16.mxu0 %vm1490_vm1, %v1489_v57  ;;  %vm1116_vm1 = vcmask 258243  }
  0x95   :  { %1307 = vmatpush3.bf16.msra.mxu1 %v1432_v58 }
 0x14f   :  { %v499_v18 = vpop.f32.mrf.mxu0 }
 0x150   :  { %v500_v19 = vadd.f32 %v499_v18, %v103_v14  ;;  %v540_v21 = vpop.f32.mrf.mxu1 }
 0x151   :  { %v501_v20 = vpop.f32.mrf.mxu0  ;;  %v541_v26 = vadd.f32 %v540_v21, %v111_v17 }
 0x152   :  { %v554_v23 = vrot.slane %v500_v19, %v1531_v30  ;;  %v502_v24 = vadd.f32 %v501_v20, %v107_v16  ;;  %v542_v28 = vpop.f32.mrf.mxu1 }
 0x153   :  { %v503_v27 = vpop.f32.mrf.mxu0  ;;  %v737_v25 = vrot.slane %v541_v26, %v1531_v30  ;;  %v543_v34 = vadd.f32 %v542_v28, %v115_v22 }
 0x154   :  { %v555_v29 = vcombine.high %v554_v23, %v554_v23  ;;  %v562_v31 = vrot.slane %v554_v23, %v1531_v30  ;;  %v646_v32 = vrot.slane %v502_v24, %v1531_v30  ;;  %v544_v35 = vpop.f32.mrf.mxu1 }
 0x155   :  { %v504_v33 = vpop.f32.mrf.mxu0  ;;  %v738_v40 = vcombine.high %v737_v25, %v737_v25  ;;  %v745_v41 = vrot.slane %v737_v25, %v1531_v30  ;;  %v828_v42 = vrot.slane %v543_v34, %v1531_v30 }
 0x156   :  { %v569_v36 = vrot.slane %v555_v29, %v1531_v30  ;;  %573 = vst.msk [vmem:[#allocation2] sm:$0x1] %vm572_vm0, %v562_v31  ;;  %v578_v37 = vrot.slane %v562_v31, %v1544_v10  ;;  %v647_v38 = vcombine.high %v646_v32, %v646_v32  ;;  %v654_v39 = vrot.slane %v646_v32, %v1531_v30  ;;  %v545_v43 = vpop.f32.mrf.mxu1 }
 0x157   :  { %v752_v45 = vrot.slane %v738_v40, %v1531_v30  ;;  %755 = vst.msk [vmem:[#allocation2 + $0x10] sm:$0x1] %vm572_vm0, %v745_v41  ;;  %v829_v46 = vcombine.high %v828_v42, %v828_v42  ;;  %v836_v47 = vrot.slane %v828_v42, %v1531_v30  ;;  %v760_v49 = vrot.slane %v745_v41, %v1544_v10  ;;  %v1433_v41 = vld [vmem:[%s1731_s1] sm:$0xff]   ;;  %s1491_s1 = smov 56  }
 0x158   :  { %574 = vst.msk [vmem:[#allocation2 + $0x20] sm:$0x1] %vm572_vm0, %v569_v36  ;;  %v661_v44 = vrot.slane %v647_v38, %v1531_v30  ;;  %664 = vst.msk [vmem:[#allocation2 + $0x8] sm:$0x1] %vm572_vm0, %v654_v39  ;;  %591 = vrot.lane.b32.xlu1 %v578_v37, %s1482_s3  ;;  %583 = vrot.lane.b32.xlu0 %v578_v37, %s1483_s24  ;;  %v669_v50 = vrot.slane %v654_v39, %v1544_v10 }
 0x159   :  { %756 = vst.msk [vmem:[#allocation2 + $0x30] sm:$0x1] %vm572_vm0, %v752_v45  ;;  %v843_v48 = vrot.slane %v829_v46, %v1531_v30  ;;  %846 = vst.msk [vmem:[#allocation2 + $0x18] sm:$0x1] %vm572_vm0, %v836_v47  ;;  %v582_v30 = vrot.slane %v569_v36, %v1544_v10  ;;  %v764_v51 = vrot.slane %v752_v45, %v1544_v10  ;;  %1299 = vmatpush3.bf16.msra.mxu0 %v1433_v41 }
 0x15a   :  { %665 = vst.msk [vmem:[#allocation2 + $0x28] sm:$0x1] %vm572_vm0, %v661_v44  ;;  %v851_v52 = vrot.slane %v836_v47, %v1544_v10  ;;  %v673_v53 = vrot.slane %v661_v44, %v1544_v10 }
 0x15b   :  { %847 = vst.msk [vmem:[#allocation2 + $0x38] sm:$0x1] %vm572_vm0, %v843_v48  ;;  %v855_v54 = vrot.slane %v843_v48, %v1544_v10 }
 0x15c   :  { %607 = vrot.lane.b32.xlu1 %v578_v37, %s1484_s25  ;;  %599 = vrot.lane.b32.xlu0 %v578_v37, %s1485_s26 }
 0x160   :  { %623 = vrot.lane.b32.xlu1 %v578_v37, %s1486_s27  ;;  %615 = vrot.lane.b32.xlu0 %v578_v37, %s1487_s28 }
 0x164   :  { %773 = vrot.lane.b32.xlu1 %v760_v49, %s1482_s3  ;;  %631 = vrot.lane.b32.xlu0 %v578_v37, %s1488_s29 }
 0x168   :  { %789 = vrot.lane.b32.xlu1 %v760_v49, %s1484_s25  ;;  %765 = vrot.lane.b32.xlu0 %v760_v49, %s1483_s24 }
 0x16c   :  { %805 = vrot.lane.b32.xlu1 %v760_v49, %s1486_s27  ;;  %781 = vrot.lane.b32.xlu0 %v760_v49, %s1485_s26 }
 0x170   :  { %797 = vrot.lane.b32.xlu0 %v760_v49, %s1487_s28  ;;  %601 = vrot.lane.b32.xlu1 %v582_v30, %s1485_s26 }
 0x174   :  { %813 = vrot.lane.b32.xlu0 %v760_v49, %s1488_s29  ;;  %609 = vrot.lane.b32.xlu1 %v582_v30, %s1484_s25 }
 0x178   :  { %625 = vrot.lane.b32.xlu1 %v582_v30, %s1486_s27  ;;  %585 = vrot.lane.b32.xlu0 %v582_v30, %s1483_s24 }
 0x17c   :  { %674 = vrot.lane.b32.xlu1 %v669_v50, %s1483_s24  ;;  %593 = vrot.lane.b32.xlu0 %v582_v30, %s1482_s3 }
 0x180   :  { %690 = vrot.lane.b32.xlu1 %v669_v50, %s1485_s26  ;;  %617 = vrot.lane.b32.xlu0 %v582_v30, %s1487_s28 }
 0x184   :  { %706 = vrot.lane.b32.xlu1 %v669_v50, %s1487_s28  ;;  %633 = vrot.lane.b32.xlu0 %v582_v30, %s1488_s29 }
 0x188   :  { %722 = vrot.lane.b32.xlu1 %v669_v50, %s1488_s29  ;;  %682 = vrot.lane.b32.xlu0 %v669_v50, %s1482_s3 }
 0x18c   :  { %775 = vrot.lane.b32.xlu1 %v764_v51, %s1482_s3  ;;  %698 = vrot.lane.b32.xlu0 %v669_v50, %s1484_s25 }
 0x190   :  { %791 = vrot.lane.b32.xlu1 %v764_v51, %s1484_s25  ;;  %714 = vrot.lane.b32.xlu0 %v669_v50, %s1486_s27 }
 0x194   :  { %807 = vrot.lane.b32.xlu1 %v764_v51, %s1486_s27  ;;  %767 = vrot.lane.b32.xlu0 %v764_v51, %s1483_s24 }
 0x198   :  { %856 = vrot.lane.b32.xlu1 %v851_v52, %s1483_s24  ;;  %783 = vrot.lane.b32.xlu0 %v764_v51, %s1485_s26 }
 0x19c   :  { %872 = vrot.lane.b32.xlu1 %v851_v52, %s1485_s26  ;;  %799 = vrot.lane.b32.xlu0 %v764_v51, %s1487_s28 }
 0x1a0   :  { %888 = vrot.lane.b32.xlu1 %v851_v52, %s1487_s28  ;;  %815 = vrot.lane.b32.xlu0 %v764_v51, %s1488_s29 }
 0x1a4   :  { %676 = vrot.lane.b32.xlu1 %v673_v53, %s1483_s24  ;;  %864 = vrot.lane.b32.xlu0 %v851_v52, %s1482_s3 }
 0x1a8   :  { %692 = vrot.lane.b32.xlu1 %v673_v53, %s1485_s26  ;;  %880 = vrot.lane.b32.xlu0 %v851_v52, %s1484_s25 }
 0x1ac   :  { %708 = vrot.lane.b32.xlu1 %v673_v53, %s1487_s28  ;;  %684 = vrot.lane.b32.xlu0 %v673_v53, %s1482_s3 }
 0x1b0   :  { %724 = vrot.lane.b32.xlu1 %v673_v53, %s1488_s29  ;;  %700 = vrot.lane.b32.xlu0 %v673_v53, %s1484_s25 }
 0x1b4   :  { %858 = vrot.lane.b32.xlu1 %v855_v54, %s1483_s24  ;;  %716 = vrot.lane.b32.xlu0 %v673_v53, %s1486_s27 }
 0x1b8   :  { %874 = vrot.lane.b32.xlu1 %v855_v54, %s1485_s26  ;;  %866 = vrot.lane.b32.xlu0 %v855_v54, %s1482_s3 }
 0x1bc   :  { %890 = vrot.lane.b32.xlu1 %v855_v54, %s1487_s28  ;;  %882 = vrot.lane.b32.xlu0 %v855_v54, %s1484_s25 }
 0x1c0   :  { %906 = vrot.lane.b32.xlu1 %v855_v54, %s1488_s29  ;;  %898 = vrot.lane.b32.xlu0 %v855_v54, %s1486_s27 }
 0x1c4   :  { %904 = vrot.lane.b32.xlu1 %v851_v52, %s1488_s29  ;;  %896 = vrot.lane.b32.xlu0 %v851_v52, %s1486_s27 }
 0x1ca   :  { %v592_v59 = vpop.permute.xlu1 %591  ;;  %v584_v60 = vpop.permute.xlu0 %583 }
 0x1cb   :  { %597 = vst.msk [vmem:[#allocation2 + $0x2] sm:$0x1] %vm572_vm0, %v592_v59  ;;  %589 = vst.msk [vmem:[#allocation2 + $0x1] sm:$0x1] %vm572_vm0, %v584_v60 }
 0x1ce   :  { %v608_v61 = vpop.permute.xlu1 %607  ;;  %v600_v62 = vpop.permute.xlu0 %599 }
 0x1cf   :  { %613 = vst.msk [vmem:[#allocation2 + $0x4] sm:$0x1] %vm572_vm0, %v608_v61  ;;  %605 = vst.msk [vmem:[#allocation2 + $0x3] sm:$0x1] %vm572_vm0, %v600_v62 }
 0x1d2   :  { %v624_v63 = vpop.permute.xlu1 %623  ;;  %v616_v0 = vpop.permute.xlu0 %615 }
 0x1d3   :  { %629 = vst.msk [vmem:[#allocation2 + $0x6] sm:$0x1] %vm572_vm0, %v624_v63  ;;  %621 = vst.msk [vmem:[#allocation2 + $0x5] sm:$0x1] %vm572_vm0, %v616_v0 }
 0x1d6   :  { %v774_v1 = vpop.permute.xlu1 %773  ;;  %v632_v2 = vpop.permute.xlu0 %631 }
 0x1d7   :  { %779 = vst.msk [vmem:[#allocation2 + $0x12] sm:$0x1] %vm572_vm0, %v774_v1  ;;  %637 = vst.msk [vmem:[#allocation2 + $0x7] sm:$0x1] %vm572_vm0, %v632_v2 }
 0x1da   :  { %v790_v3 = vpop.permute.xlu1 %789  ;;  %v766_v4 = vpop.permute.xlu0 %765 }
 0x1db   :  { %795 = vst.msk [vmem:[#allocation2 + $0x14] sm:$0x1] %vm572_vm0, %v790_v3  ;;  %771 = vst.msk [vmem:[#allocation2 + $0x11] sm:$0x1] %vm572_vm0, %v766_v4 }
 0x1de   :  { %v806_v5 = vpop.permute.xlu1 %805  ;;  %v782_v6 = vpop.permute.xlu0 %781  ;;  %v912_v31 = vld [vmem:[#allocation2] sm:$0xff] }
 0x1df   :  { %811 = vst.msk [vmem:[#allocation2 + $0x16] sm:$0x1] %vm572_vm0, %v806_v5  ;;  %787 = vst.msk [vmem:[#allocation2 + $0x13] sm:$0x1] %vm572_vm0, %v782_v6 }
 0x1e2   :  { %v798_v7 = vpop.permute.xlu0 %797  ;;  %v602_v8 = vpop.permute.xlu1 %601 }
 0x1e3   :  { %803 = vst.msk [vmem:[#allocation2 + $0x15] sm:$0x1] %vm572_vm0, %v798_v7  ;;  %606 = vst.msk [vmem:[#allocation2 + $0x23] sm:$0x1] %vm572_vm0, %v602_v8 }
 0x1e6   :  { %v814_v9 = vpop.permute.xlu0 %813  ;;  %v610_v10 = vpop.permute.xlu1 %609 }
 0x1e7   :  { %819 = vst.msk [vmem:[#allocation2 + $0x17] sm:$0x1] %vm572_vm0, %v814_v9  ;;  %614 = vst.msk [vmem:[#allocation2 + $0x24] sm:$0x1] %vm572_vm0, %v610_v10 }
 0x1ea   :  { %v626_v11 = vpop.permute.xlu1 %625  ;;  %v586_v12 = vpop.permute.xlu0 %585 }
 0x1eb   :  { %630 = vst.msk [vmem:[#allocation2 + $0x26] sm:$0x1] %vm572_vm0, %v626_v11  ;;  %590 = vst.msk [vmem:[#allocation2 + $0x21] sm:$0x1] %vm572_vm0, %v586_v12 }
 0x1ee   :  { %v675_v13 = vpop.permute.xlu1 %674  ;;  %v594_v14 = vpop.permute.xlu0 %593  ;;  %v914_v61 = vld [vmem:[#allocation2 + $0x10] sm:$0xff] }
 0x1ef   :  { %680 = vst.msk [vmem:[#allocation2 + $0x9] sm:$0x1] %vm572_vm0, %v675_v13  ;;  %598 = vst.msk [vmem:[#allocation2 + $0x22] sm:$0x1] %vm572_vm0, %v594_v14 }
 0x1f2   :  { %v691_v15 = vpop.permute.xlu1 %690  ;;  %v618_v16 = vpop.permute.xlu0 %617 }
 0x1f3   :  { %696 = vst.msk [vmem:[#allocation2 + $0xb] sm:$0x1] %vm572_vm0, %v691_v15  ;;  %622 = vst.msk [vmem:[#allocation2 + $0x25] sm:$0x1] %vm572_vm0, %v618_v16 }
 0x1f6   :  { %v707_v17 = vpop.permute.xlu1 %706  ;;  %v634_v18 = vpop.permute.xlu0 %633 }
 0x1f7   :  { %712 = vst.msk [vmem:[#allocation2 + $0xd] sm:$0x1] %vm572_vm0, %v707_v17  ;;  %638 = vst.msk [vmem:[#allocation2 + $0x27] sm:$0x1] %vm572_vm0, %v634_v18 }
 0x1fa   :  { %v723_v19 = vpop.permute.xlu1 %722  ;;  %v683_v20 = vpop.permute.xlu0 %682 }
 0x1fb   :  { %728 = vst.msk [vmem:[#allocation2 + $0xf] sm:$0x1] %vm572_vm0, %v723_v19  ;;  %688 = vst.msk [vmem:[#allocation2 + $0xa] sm:$0x1] %vm572_vm0, %v683_v20 }
 0x1fe   :  { %v776_v21 = vpop.permute.xlu1 %775  ;;  %v699_v22 = vpop.permute.xlu0 %698  ;;  %v916_v51 = vld [vmem:[#allocation2 + $0x20] sm:$0xff] }
 0x1ff   :  { %780 = vst.msk [vmem:[#allocation2 + $0x32] sm:$0x1] %vm572_vm0, %v776_v21  ;;  %704 = vst.msk [vmem:[#allocation2 + $0xc] sm:$0x1] %vm572_vm0, %v699_v22 }
 0x202   :  { %v792_v23 = vpop.permute.xlu1 %791  ;;  %v715_v24 = vpop.permute.xlu0 %714 }
 0x203   :  { %796 = vst.msk [vmem:[#allocation2 + $0x34] sm:$0x1] %vm572_vm0, %v792_v23  ;;  %720 = vst.msk [vmem:[#allocation2 + $0xe] sm:$0x1] %vm572_vm0, %v715_v24 }
 0x206   :  { %v808_v26 = vpop.permute.xlu1 %807  ;;  %v768_v27 = vpop.permute.xlu0 %767 }
 0x207   :  { %812 = vst.msk [vmem:[#allocation2 + $0x36] sm:$0x1] %vm572_vm0, %v808_v26  ;;  %772 = vst.msk [vmem:[#allocation2 + $0x31] sm:$0x1] %vm572_vm0, %v768_v27 }
 0x20a   :  { %v857_v28 = vpop.permute.xlu1 %856  ;;  %v784_v29 = vpop.permute.xlu0 %783  ;;  %v913_v32 = vld [vmem:[#allocation2 + $0x8] sm:$0xff] }
 0x20b   :  { %862 = vst.msk [vmem:[#allocation2 + $0x19] sm:$0x1] %vm572_vm0, %v857_v28  ;;  %788 = vst.msk [vmem:[#allocation2 + $0x33] sm:$0x1] %vm572_vm0, %v784_v29  ;;  %v920_v25 = vpack.c.bf16 %v913_v32, %v912_v31 }
 0x20d   :  { %932 = vxpose.xlu1.c.b16.start [1/2] (short) (narrow) %v920_v25, 16 }
 0x20e   :  { %v873_v33 = vpop.permute.xlu1 %872  ;;  %v800_v34 = vpop.permute.xlu0 %799 }
 0x20f   :  { %878 = vst.msk [vmem:[#allocation2 + $0x1b] sm:$0x1] %vm572_vm0, %v873_v33  ;;  %804 = vst.msk [vmem:[#allocation2 + $0x35] sm:$0x1] %vm572_vm0, %v800_v34 }
 0x212   :  { %v889_v35 = vpop.permute.xlu1 %888  ;;  %v816_v36 = vpop.permute.xlu0 %815 }
 0x213   :  { %894 = vst.msk [vmem:[#allocation2 + $0x1d] sm:$0x1] %vm572_vm0, %v889_v35  ;;  %820 = vst.msk [vmem:[#allocation2 + $0x37] sm:$0x1] %vm572_vm0, %v816_v36 }
 0x216   :  { %v677_v37 = vpop.permute.xlu1 %676  ;;  %v865_v38 = vpop.permute.xlu0 %864 }
 0x217   :  { %681 = vst.msk [vmem:[#allocation2 + $0x29] sm:$0x1] %vm572_vm0, %v677_v37  ;;  %870 = vst.msk [vmem:[#allocation2 + $0x1a] sm:$0x1] %vm572_vm0, %v865_v38 }
 0x21a   :  { %v693_v39 = vpop.permute.xlu1 %692  ;;  %v881_v40 = vpop.permute.xlu0 %880  ;;  %v918_v58 = vld [vmem:[#allocation2 + $0x30] sm:$0xff] }
 0x21b   :  { %697 = vst.msk [vmem:[#allocation2 + $0x2b] sm:$0x1] %vm572_vm0, %v693_v39  ;;  %886 = vst.msk [vmem:[#allocation2 + $0x1c] sm:$0x1] %vm572_vm0, %v881_v40 }
 0x21e   :  { %v709_v42 = vpop.permute.xlu1 %708  ;;  %v685_v43 = vpop.permute.xlu0 %684 }
 0x21f   :  { %713 = vst.msk [vmem:[#allocation2 + $0x2d] sm:$0x1] %vm572_vm0, %v709_v42  ;;  %689 = vst.msk [vmem:[#allocation2 + $0x2a] sm:$0x1] %vm572_vm0, %v685_v43 }
 0x222   :  { %v725_v44 = vpop.permute.xlu1 %724  ;;  %v701_v45 = vpop.permute.xlu0 %700 }
 0x223   :  { %729 = vst.msk [vmem:[#allocation2 + $0x2f] sm:$0x1] %vm572_vm0, %v725_v44  ;;  %705 = vst.msk [vmem:[#allocation2 + $0x2c] sm:$0x1] %vm572_vm0, %v701_v45 }
 0x226   :  { %v859_v46 = vpop.permute.xlu1 %858  ;;  %v717_v47 = vpop.permute.xlu0 %716 }
 0x227   :  { %863 = vst.msk [vmem:[#allocation2 + $0x39] sm:$0x1] %vm572_vm0, %v859_v46  ;;  %721 = vst.msk [vmem:[#allocation2 + $0x2e] sm:$0x1] %vm572_vm0, %v717_v47 }
 0x22a   :  { %v875_v48 = vpop.permute.xlu1 %874  ;;  %v867_v49 = vpop.permute.xlu0 %866 }
 0x22b   :  { %879 = vst.msk [vmem:[#allocation2 + $0x3b] sm:$0x1] %vm572_vm0, %v875_v48  ;;  %871 = vst.msk [vmem:[#allocation2 + $0x3a] sm:$0x1] %vm572_vm0, %v867_v49 }
 0x22e   :  { %v891_v30 = vpop.permute.xlu1 %890  ;;  %v883_v50 = vpop.permute.xlu0 %882  ;;  %v917_v52 = vld [vmem:[#allocation2 + $0x28] sm:$0xff] }
 0x22f   :  { %895 = vst.msk [vmem:[#allocation2 + $0x3d] sm:$0x1] %vm572_vm0, %v891_v30  ;;  %887 = vst.msk [vmem:[#allocation2 + $0x3c] sm:$0x1] %vm572_vm0, %v883_v50  ;;  %v922_v53 = vpack.c.bf16 %v917_v52, %v916_v51 }
 0x231   :  { %1005 = vxpose.xlu0.c.b16.start [1/2] (short) (narrow) %v922_v53, 16 }
 0x232   :  { %v907_v54 = vpop.permute.xlu1 %906  ;;  %v899_v55 = vpop.permute.xlu0 %898 }
 0x233   :  { %911 = vst.msk [vmem:[#allocation2 + $0x3f] sm:$0x1] %vm572_vm0, %v907_v54  ;;  %903 = vst.msk [vmem:[#allocation2 + $0x3e] sm:$0x1] %vm572_vm0, %v899_v55 }
 0x236   :  { %v905_v56 = vpop.permute.xlu1 %904  ;;  %v897_v57 = vpop.permute.xlu0 %896 }
 0x237   :  { %910 = vst.msk [vmem:[#allocation2 + $0x1f] sm:$0x1] %vm572_vm0, %v905_v56  ;;  %902 = vst.msk [vmem:[#allocation2 + $0x1e] sm:$0x1] %vm572_vm0, %v897_v57  ;;  %vm1109_vm0 = vcmask 191618  }
 0x23a   :  { %v919_v59 = vld [vmem:[#allocation2 + $0x38] sm:$0xff] }
 0x23b   :  { %v923_v60 = vpack.c.bf16 %v919_v59, %v918_v58 }
 0x23d   :  { %1006 = vxpose.xlu0.c.b16.end [2/2] (short) (narrow) %v923_v60, 16 }
 0x23e   :  { %v915_v62 = vld [vmem:[#allocation2 + $0x18] sm:$0xff] }
 0x23f   :  { %v921_v63 = vpack.c.bf16 %v915_v62, %v914_v61 }
 0x241   :  { %933 = vxpose.xlu1.c.b16.end [2/2] (short) (narrow) %v921_v63, 16 }
 0x29b   :  { %v1013_v0 = vpop.trf.xlu0 }
 0x29c   :  { %1309 = vmatmul.mubr.msk.bf16.vlgmr.msra.gmra.mxu1 %vm960_vm2, %v1013_v0 }
 0x29f   :  { %v940_v1 = vpop.trf.xlu1 }
 0x2a0   :  { %1301 = vmatmul.mubr.msk.bf16.vlgmr.msra.gmra.mxu0 %vm960_vm2, %v940_v1  ;;  %vm1123_vm2 = vcmask 324868  }
 0x35c   :  { %v1070_v2 = vpop.f32.mrf.mxu1 }
 0x35d   :  { %vm1079_vm3 = vcmp.ge.f32.partialorder %v1070_v2, 0.0  ;;  %v1083_v3 = vmul.f32 0.001, %v1070_v2 }
 0x35e   :  { %v1310_v4 = vpop.f32.mrf.mxu1 }
 0x35f   :  { %v1087_v5 = vsel %vm1079_vm3, %v1070_v2, %v1083_v3  ;;  %vm1130_vm3 = vcmask 391493  }
 0x360   :  { %v1091_v6 = vrot.slane %v1087_v5, 7  ;;  %v998_v7 = vpop.f32.mrf.mxu0  ;;  %v1073_v8 = vpop.f32.mrf.mxu1 }
 0x361   :  { %vm1077_vm4 = vcmp.ge.f32.partialorder %v998_v7, 0.0  ;;  %v1081_v9 = vmul.f32 0.001, %v998_v7  ;;  %v1084_v18 = vmul.f32 0.001, %v1073_v8  ;;  %vm1080_vm11 = vcmp.ge.f32.partialorder %v1073_v8, 0.0 }
 0x362   :  { %v1302_v10 = vpop.f32.mrf.mxu0  ;;  %1141 = vrot.lane.b32.xlu1 %v1091_v6, %s1491_s1  ;;  %v1311_v11 = vpop.f32.mrf.mxu1 }
 0x363   :  { %v1085_v12 = vsel %vm1077_vm4, %v998_v7, %v1081_v9  ;;  %v1088_v22 = vsel %vm1080_vm11, %v1073_v8, %v1084_v18  ;;  %vm1137_vm4 = vcmask 458118   ;;  %vm1180_vm11 = vcmask 849668  }
 0x364   :  { %v1001_v13 = vpop.f32.mrf.mxu0  ;;  %1139 = vrot.lane.b32.xlu0 %v1085_v12, %s1491_s1  ;;  %v1105_v14 = vsel %vm1104_vm5, %v1091_v6, %v1085_v12  ;;  %v1093_v16 = vsel %vm1092_vm6, %v1091_v6, %v1085_v12  ;;  %v1098_v17 = vsel %vm1097_vm7, %v1091_v6, %v1085_v12  ;;  %v1119_v19 = vsel %vm1118_vm9, %v1091_v6, %v1085_v12 }
 0x365   :  { %1096 = vst.msk [vmem:[#allocation6] sm:$0x3] %vm1095_vm8, %v1093_v16  ;;  %v1082_v20 = vmul.f32 0.001, %v1001_v13  ;;  %vm1078_vm13 = vcmp.ge.f32.partialorder %v1001_v13, 0.0  ;;  %v1112_v21 = vsel %vm1111_vm10, %v1091_v6, %v1085_v12  ;;  %v1133_v23 = vsel %vm1132_vm12, %v1091_v6, %v1085_v12 }
 0x366   :  { %v1303_v15 = vpop.f32.mrf.mxu0  ;;  %1106 = vrot.lane.b32.xlu1 %v1105_v14, %s1488_s29  ;;  %v1151_v26 = vrot.slane %v1088_v22, 7  ;;  %v1126_v27 = vsel %vm1125_vm14, %v1091_v6, %v1085_v12  ;;  %vm1162_vm8 = vcmask 649793  }
 0x367   :  { %v1086_v24 = vsel %vm1078_vm13, %v1001_v13, %v1082_v20  ;;  %vm1192_vm13 = vcmask 982918  }
 0x368   :  { %1099 = vrot.lane.b32.xlu0 %v1098_v17, %s1480_s19  ;;  %v1158_v28 = vsel %vm1097_vm7, %v1151_v26, %v1086_v24  ;;  %v1152_v29 = vsel %vm1092_vm6, %v1151_v26, %v1086_v24  ;;  %v1170_v31 = vsel %vm1111_vm10, %v1151_v26, %v1086_v24  ;;  %v1164_v32 = vsel %vm1104_vm5, %v1151_v26, %v1086_v24  ;;  %s1210_s19 = sshll.u32 %s1498_s18, 4  ;;  %s1211_s19 = int_to_ptr.vmem [resolvable:$true] %s1210_s19 }
 0x369   :  { %v1182_v25 = vsel %vm1125_vm14, %v1151_v26, %v1086_v24  ;;  %v1176_v33 = vsel %vm1118_vm9, %v1151_v26, %v1086_v24  ;;  %v1188_v34 = vsel %vm1132_vm12, %v1151_v26, %v1086_v24  ;;  %vm1145_vm5 = vcmask 523719   ;;  %s1454_s20 = scalar_lea.vmem %s1211_s19, 32  ;;  %p1459_p6 = scmp.lt.s32.totalorder %s1211_s19, %s1211_s19 }
 0x36a   :  { %1120 = vrot.lane.b32.xlu1 %v1119_v19, %s1486_s27  ;;  %vm1147_vm6 = vcmask 516544   ;;  %vm1156_vm7 = vcmask 583168   ;;  %vm1168_vm9 = vcmask 716418   ;;  %vm1174_vm10 = vcmask 783043   ;;  %p1455_p5 = scmp.ne.s32.totalorder %s1211_s19, %s1454_s20  ;;  %p1460_p7 = scmp.lt.s32.totalorder %s1454_s20, %s1454_s20 }
 0x36b   :  { %vm1186_vm12 = vcmask 916293   ;;  %vm1200_vm14 = vcmask 1048519  }
 0x36c   :  { %1113 = vrot.lane.b32.xlu0 %v1112_v21, %s1492_s12  ;;  %p1461_p8 = por %p1460_p7, %p1459_p6 }
 0x36e   :  { %1134 = vrot.lane.b32.xlu1 %v1133_v23, %s1487_s28  ;;  %p1462_p9 = pnand %p1461_p8, %p1455_p5 }
 0x370   :  { %1127 = vrot.lane.b32.xlu0 %v1126_v27, %s1493_s13 }
 0x372   :  { %1159 = vrot.lane.b32.xlu1 %v1158_v28, %s1494_s14 }
 0x374   :  { %1153 = vrot.lane.b32.xlu0 %v1152_v29, %s1484_s25 }
 0x376   :  { %1171 = vrot.lane.b32.xlu1 %v1170_v31, %s1495_s15 }
 0x378   :  { %1165 = vrot.lane.b32.xlu0 %v1164_v32, %s1485_s26 }
 0x37a   :  { %1183 = vrot.lane.b32.xlu1 %v1182_v25, %s1496_s16 }
 0x37c   :  { %1177 = vrot.lane.b32.xlu0 %v1176_v33, %s1482_s3 }
 0x37e   :  { %1194 = vrot.lane.b32.xlu1 %v1086_v24, %s1497_s17 }
 0x380   :  { %1189 = vrot.lane.b32.xlu0 %v1188_v34, %s1483_s24 }
 0x384   :  { %1196 = vrot.lane.b32.xlu0 %v1151_v26, %s1497_s17 }
 0x3d4   :  { %v1142_v35 = vpop.permute.xlu1 %1141 }
 0x3d6   :  { %v1140_v36 = vpop.permute.xlu0 %1139 }
 0x3d8   :  { %v1107_v37 = vpop.permute.xlu1 %1106 }
 0x3da   :  { %v1100_v38 = vpop.permute.xlu0 %1099 }
 0x3db   :  { %1103 = vst.msk [vmem:[#allocation6 - $0x1] sm:$0x6] %vm1102_vm15, %v1100_v38  ;;  %vm1202_vm15 = vcmask 1041344  }
 0x3dc   :  { %v1121_v39 = vpop.permute.xlu1 %1120  ;;  %1110 = vst.msk [vmem:[#allocation6 - $0x2] sm:$0xc] %vm1109_vm0, %v1107_v37 }
 0x3de   :  { %v1114_v40 = vpop.permute.xlu0 %1113 }
 0x3df   :  { %1117 = vst.msk [vmem:[#allocation6 - $0x3] sm:$0x18] %vm1116_vm1, %v1114_v40 }
 0x3e0   :  { %v1135_v41 = vpop.permute.xlu1 %1134  ;;  %1124 = vst.msk [vmem:[#allocation6 - $0x4] sm:$0x30] %vm1123_vm2, %v1121_v39 }
 0x3e2   :  { %v1128_v42 = vpop.permute.xlu0 %1127 }
 0x3e3   :  { %1131 = vst.msk [vmem:[#allocation6 - $0x5] sm:$0x60] %vm1130_vm3, %v1128_v42 }
 0x3e4   :  { %1138 = vst.msk [vmem:[#allocation6 - $0x6] sm:$0xc0] %vm1137_vm4, %v1135_v41  ;;  %v1160_v43 = vpop.permute.xlu1 %1159 }
 0x3e5   :  { %1146 = vst.msk [vmem:[#allocation6 - $0x7] sm:$0x80] %vm1145_vm5, %v1140_v36 }
 0x3e6   :  { %1148 = vst.msk [vmem:[#allocation6 + $0x1] sm:$0x1] %vm1147_vm6, %v1142_v35  ;;  %v1154_v44 = vpop.permute.xlu0 %1153 }
 0x3e7   :  { %1157 = vst.msk [vmem:[#allocation6] sm:$0x3] %vm1156_vm7, %v1154_v44 }
 0x3e8   :  { %v1172_v45 = vpop.permute.xlu1 %1171  ;;  %1163 = vst.msk [vmem:[#allocation6 - $0x1] sm:$0x6] %vm1162_vm8, %v1160_v43 }
 0x3ea   :  { %v1166_v46 = vpop.permute.xlu0 %1165 }
 0x3eb   :  { %1169 = vst.msk [vmem:[#allocation6 - $0x2] sm:$0xc] %vm1168_vm9, %v1166_v46 }
 0x3ec   :  { %1175 = vst.msk [vmem:[#allocation6 - $0x3] sm:$0x18] %vm1174_vm10, %v1172_v45  ;;  %v1184_v47 = vpop.permute.xlu1 %1183 }
 0x3ee   :  { %v1178_v48 = vpop.permute.xlu0 %1177 }
 0x3ef   :  { %1181 = vst.msk [vmem:[#allocation6 - $0x4] sm:$0x30] %vm1180_vm11, %v1178_v48 }
 0x3f0   :  { %1187 = vst.msk [vmem:[#allocation6 - $0x5] sm:$0x60] %vm1186_vm12, %v1184_v47  ;;  %v1195_v30 = vpop.permute.xlu1 %1194 }
 0x3f2   :  { %v1190_v49 = vpop.permute.xlu0 %1189 }
 0x3f3   :  { %1193 = vst.msk [vmem:[#allocation6 - $0x6] sm:$0xc0] %vm1192_vm13, %v1190_v49 }
 0x3f4   :  { %1201 = vst.msk [vmem:[#allocation6 - $0x7] sm:$0x80] %vm1200_vm14, %v1195_v30 }
 0x3f6   :  { %v1197_v50 = vpop.permute.xlu0 %1196 }
 0x3f7   :  { %1203 = vst.msk [vmem:[#allocation6 + $0x1] sm:$0x1] %vm1202_vm15, %v1197_v50 }
 0x3f8   :  { %1465 = shalt.err (!%p1462_p9)
}
 0x3f9   :  { %1213 = dma.vmem_to_hbm [thread:$0]  %s1211_s19, 32, %s1734_s4, [#allocation5]  }
 0x3fa   :  { %1476 = dma.done.wait [#allocation5], 32  }
 0x3fb   :  { %1477 = vsyncadd [#allocation5], 4294967264 }
 0x3fc   :  { %1217 = vsyncpa [#allocation4], 1 }
 0x3fd   :  { %1218 = vsyncpa [#allocation5], 1 }

</bundles_post_ra>
